<compile_context>
chip_gen: v7x
topology: tpu7x:2x2x1
jax: 0.10.0
libtpu: 0.0.40
codegen_flags: <defaults>
</compile_context>

<pallas_src>
import functools
import math

import jax
import jax.numpy as jnp
from jax.experimental import pallas as pl
from jax.experimental.pallas import tpu as pltpu


def _round_up(x, m):
    return ((x + m - 1) // m) * m


def _modified_mlp_kernel(x_ref, e1_ref, e2_ref,
                         w1_ref, b1_ref, w2_ref, b2_ref, w3_ref, b3_ref,
                         w4_ref, b4_ref, w5_ref, b5_ref, o_ref,
                         *, compute_dtype, act_dtype):
    """Fused 5-layer MLP with encoder gating for one (block_m, .) row tile."""
    f32 = jnp.float32

    # Gate rewrite: h*e1 + (1-h)*e2 == h*(e1-e2) + e2.  d hoisted once per tile.
    e2 = e2_ref[...]                      # (bm, H) f32
    d = e1_ref[...] - e2                  # (bm, H) f32

    def act_gate(pre):
        # tanh in act_dtype (bf16 doubles EUP throughput on v6e/v7x); gate in f32.
        h = jnp.tanh(pre.astype(act_dtype)).astype(f32)
        return h * d + e2

    # fc1 on the VPU: K = input_dim is tiny (e.g. 2), so a 128-padded MXU pass
    # would be ~64x wasted work and wasted HBM reads of zeros.
    x = x_ref[...]                        # (bm, K) f32
    pre = b1_ref[...]                     # (1, H)  f32 -> broadcasts on first add
    for k in range(x_ref.shape[1]):       # unrolled at trace time (K is static)
        pre = pre + x[:, k:k + 1] * w1_ref[k:k + 1, :]
    h = act_gate(pre)

    # fc2..fc4: MXU matmuls, bf16 operands with f32 accumulation; layers unrolled.
    for w_ref, b_ref in ((w2_ref, b2_ref), (w3_ref, b3_ref), (w4_ref, b4_ref)):
        pre = jnp.dot(h.astype(compute_dtype), w_ref[...],
                      preferred_element_type=f32) + b_ref[...]
        h = act_gate(pre)

    # fc5 has a single output unit: lane reduction (XLU/VPU) + (bm, 1) store
    # instead of an MXU pass and a 128-wide padded writeback slab.
    out = jnp.sum(h * w5_ref[...], axis=-1, keepdims=True) + b5_ref[...]
    o_ref[...] = out.astype(o_ref.dtype)


def modified_mlp_forward(x, enc1, enc2, params, *, block_m=512,
                         compute_dtype=jnp.bfloat16,
                         act_dtype=jnp.bfloat16,      # use jnp.float32 on v5e
                         out_dtype=jnp.float32,
                         vmem_limit_bytes=None):
    """x: (M, K) f32; enc1/enc2: (M, H) f32; params: [(w_i, b_i)], w as (in, out)."""
    (w1, b1), (w2, b2), (w3, b3), (w4, b4), (w5, b5) = params
    M, K = x.shape
    H = w1.shape[1]
    assert w1.shape == (K, H)
    assert enc1.shape == (M, H) and enc2.shape == (M, H)
    assert w5.shape == (H, 1)

    f32 = jnp.float32
    cd = compute_dtype

    # Batch tile: multiple of 8 sublanes; cap so the grid keeps >=2 steps when
    # possible (both v7x TensorCores get work via the "parallel" axis).
    block_m = _round_up(min(block_m, max(8, _round_up((M + 1) // 2, 8))), 8)
    M_pad = _round_up(M, block_m)
    if M_pad != M:
        row_pad = ((0, M_pad - M), (0, 0))
        x = jnp.pad(x, row_pad)
        enc1 = jnp.pad(enc1, row_pad)
        enc2 = jnp.pad(enc2, row_pad)

    # Tiny weight prep (81x81); streamed activations are passed through untouched.
    w1f = w1.astype(f32)
    b1f = b1.reshape(1, H).astype(f32)
    w2c, w3c, w4c = (w.astype(cd) for w in (w2, w3, w4))
    b2f, b3f, b4f = (b.reshape(1, H).astype(f32) for b in (b2, b3, b4))
    w5row = w5.reshape(1, H).astype(f32)       # fc5 weights as a lane row
    b5f = b5.reshape(1, 1).astype(f32)

    grid = (M_pad // block_m,)

    def stream_spec(cols):
        # NOTE: if profiling shows exposed DMA at moderate block_m, add
        # pipeline_mode=pl.Buffered(3) here (keep weight specs default).
        return pl.BlockSpec((block_m, cols), lambda i: (i, 0))

    def const_spec(r, c):
        return pl.BlockSpec((r, c), lambda i: (0, 0))

    kernel = functools.partial(_modified_mlp_kernel,
                               compute_dtype=cd, act_dtype=act_dtype)

    out = pl.pallas_call(
        kernel,
        out_shape=jax.ShapeDtypeStruct((M_pad, 1), out_dtype),
        grid_spec=pltpu.PrefetchScalarGridSpec(
            num_scalar_prefetch=0,
            grid=grid,
            in_specs=[
                stream_spec(K),                        # x tile           (bm, K)
                stream_spec(H),                        # enc1 tile        (bm, H)
                stream_spec(H),                        # enc2 tile        (bm, H)
                const_spec(K, H), const_spec(1, H),    # fc1 (VPU path)
                const_spec(H, H), const_spec(1, H),    # fc2
                const_spec(H, H), const_spec(1, H),    # fc3
                const_spec(H, H), const_spec(1, H),    # fc4
                const_spec(1, H), const_spec(1, 1),    # fc5 row + bias
            ],
            out_specs=stream_spec(1),
        ),
        compiler_params=pltpu.CompilerParams(
            dimension_semantics=("parallel",),
            vmem_limit_bytes=vmem_limit_bytes,
        ),
    )(x, enc1, enc2,
      w1f, b1f, w2c, b2f, w3c, b3f, w4c, b4f, w5row, b5f)

    return out[:M]


def init_modified_mlp_params(key, input_dim, hidden_dim=81, dtype=jnp.float32):
    """Xavier-uniform weights (like nn.init.xavier_uniform_), zero biases.

    Weights stored pre-transposed as (in_dim, out_dim) for the x @ W layout.
    """
    dims = [(input_dim, hidden_dim), (hidden_dim, hidden_dim),
            (hidden_dim, hidden_dim), (hidden_dim, hidden_dim),
            (hidden_dim, 1)]
    keys = jax.random.split(key, len(dims))
    params = []
    for k, (fan_in, fan_out) in zip(keys, dims):
        limit = math.sqrt(6.0 / (fan_in + fan_out))
        w = jax.random.uniform(k, (fan_in, fan_out), dtype=dtype,
                               minval=-limit, maxval=limit)
        b = jnp.zeros((fan_out,), dtype=dtype)
        params.append((w, b))
    return params


def modified_mlp_reference(x, enc1, enc2, params, *,
                           compute_dtype=jnp.bfloat16, act_dtype=jnp.bfloat16):
    """Plain-JAX reference with matching precision (bf16 MXU / tanh, f32 gate)."""
    f32 = jnp.float32
    (w1, b1), (w2, b2), (w3, b3), (w4, b4), (w5, b5) = params
    d = enc1 - enc2

    def act_gate(pre):
        h = jnp.tanh(pre.astype(act_dtype)).astype(f32)
        return h * d + enc2

    h = act_gate(x @ w1 + b1)                               # fc1 in f32
    for w, b in ((w2, b2), (w3, b3), (w4, b4)):
        pre = jnp.dot(h.astype(compute_dtype), w.astype(compute_dtype),
                      preferred_element_type=f32) + b
        h = act_gate(pre)
    return h @ w5 + b5                                      # fc5 in f32


if __name__ == "__main__":
    batch = 256        # 2 row-tiles of 128 -> exercises the tiled/parallel grid
    input_dim = 2      # e.g. (x, t) PINN collocation points
    hidden_dim = 81    # module default

    key = jax.random.PRNGKey(0)
    kx, k1, k2, kp = jax.random.split(key, 4)
    x = jax.random.normal(kx, (batch, input_dim), dtype=jnp.float32)
    enc1 = jax.random.normal(k1, (batch, hidden_dim), dtype=jnp.float32)
    enc2 = jax.random.normal(k2, (batch, hidden_dim), dtype=jnp.float32)
    params = init_modified_mlp_params(kp, input_dim, hidden_dim)

    fwd = jax.jit(functools.partial(modified_mlp_forward, block_m=128,
                                    compute_dtype=jnp.bfloat16,
                                    act_dtype=jnp.bfloat16))
    out = jax.block_until_ready(fwd(x, enc1, enc2, params))
    assert out.shape == (batch, 1)

    ref = modified_mlp_reference(x, enc1, enc2, params,
                                 compute_dtype=jnp.bfloat16,
                                 act_dtype=jnp.bfloat16)
    ref = jax.block_until_ready(ref)
    max_err = float(jnp.max(jnp.abs(out - ref)))
    assert jnp.allclose(out, ref, atol=2e-2, rtol=2e-2), f"max abs err {max_err}"

    print("KERNEL_OK")
</pallas_src>

<mosaic_0001>
module attributes {stable_mosaic.version = 11 : i64} {
  func.func @_modified_mlp_kernel(%arg0: i32, %arg1: memref<128x2xf32, #tpu.memory_space<vmem>>, %arg2: memref<128x81xf32, #tpu.memory_space<vmem>>, %arg3: memref<128x81xf32, #tpu.memory_space<vmem>>, %arg4: memref<2x81xf32, #tpu.memory_space<vmem>>, %arg5: memref<1x81xf32, #tpu.memory_space<vmem>>, %arg6: memref<81x81xbf16, #tpu.memory_space<vmem>>, %arg7: memref<1x81xf32, #tpu.memory_space<vmem>>, %arg8: memref<81x81xbf16, #tpu.memory_space<vmem>>, %arg9: memref<1x81xf32, #tpu.memory_space<vmem>>, %arg10: memref<81x81xbf16, #tpu.memory_space<vmem>>, %arg11: memref<1x81xf32, #tpu.memory_space<vmem>>, %arg12: memref<1x81xf32, #tpu.memory_space<vmem>>, %arg13: memref<1x1xf32, #tpu.memory_space<vmem>>, %arg14: memref<128x1xf32, #tpu.memory_space<vmem>>) attributes {dimension_semantics = [#tpu.dimension_semantics<parallel>], iteration_bounds = array<i64: 2>, scalar_prefetch = 0 : i64, scratch_operands = 0 : i64, tpu.core_type = #tpu.core_type<tc>, window_params = [{transform_indices = @transform_0, window_bounds = array<i64: 128, 2>}, {transform_indices = @transform_1, window_bounds = array<i64: 128, 81>}, {transform_indices = @transform_2, window_bounds = array<i64: 128, 81>}, {pipeline_mode = #tpu.pipeline_mode<synchronous>, transform_indices = @transform_3, window_bounds = array<i64: 2, 81>}, {pipeline_mode = #tpu.pipeline_mode<synchronous>, transform_indices = @transform_4, window_bounds = array<i64: 1, 81>}, {pipeline_mode = #tpu.pipeline_mode<synchronous>, transform_indices = @transform_5, window_bounds = array<i64: 81, 81>}, {pipeline_mode = #tpu.pipeline_mode<synchronous>, transform_indices = @transform_6, window_bounds = array<i64: 1, 81>}, {pipeline_mode = #tpu.pipeline_mode<synchronous>, transform_indices = @transform_7, window_bounds = array<i64: 81, 81>}, {pipeline_mode = #tpu.pipeline_mode<synchronous>, transform_indices = @transform_8, window_bounds = array<i64: 1, 81>}, {pipeline_mode = #tpu.pipeline_mode<synchronous>, transform_indices = @transform_9, window_bounds = array<i64: 81, 81>}, {pipeline_mode = #tpu.pipeline_mode<synchronous>, transform_indices = @transform_10, window_bounds = array<i64: 1, 81>}, {pipeline_mode = #tpu.pipeline_mode<synchronous>, transform_indices = @transform_11, window_bounds = array<i64: 1, 81>}, {pipeline_mode = #tpu.pipeline_mode<synchronous>, transform_indices = @transform_12, window_bounds = array<i64: 1, 1>}, {transform_indices = @transform_13, window_bounds = array<i64: 128, 1>}]} {
    %c0 = arith.constant 0 : index
    %c0_0 = arith.constant 0 : index
    %0 = vector.load %arg3[%c0, %c0_0] : memref<128x81xf32, #tpu.memory_space<vmem>>, vector<128x81xf32>
    %c0_1 = arith.constant 0 : index
    %c0_2 = arith.constant 0 : index
    %1 = vector.load %arg2[%c0_1, %c0_2] : memref<128x81xf32, #tpu.memory_space<vmem>>, vector<128x81xf32>
    %2 = arith.subf %1, %0 : vector<128x81xf32>
    %c0_3 = arith.constant 0 : index
    %c0_4 = arith.constant 0 : index
    %3 = vector.load %arg1[%c0_3, %c0_4] : memref<128x2xf32, #tpu.memory_space<vmem>>, vector<128x2xf32>
    %c0_5 = arith.constant 0 : index
    %c0_6 = arith.constant 0 : index
    %4 = vector.load %arg5[%c0_5, %c0_6] : memref<1x81xf32, #tpu.memory_space<vmem>>, vector<1x81xf32>
    %5 = vector.extract_strided_slice %3 {offsets = [0, 0], sizes = [128, 1], strides = [1, 1]} : vector<128x2xf32> to vector<128x1xf32>
    %c0_7 = arith.constant 0 : index
    %c0_8 = arith.constant 0 : index
    %6 = vector.load %arg4[%c0_7, %c0_8] : memref<2x81xf32, #tpu.memory_space<vmem>>, vector<1x81xf32>
    %7 = vector.broadcast %5 : vector<128x1xf32> to vector<128x81xf32>
    %8 = vector.broadcast %6 : vector<1x81xf32> to vector<128x81xf32>
    %9 = arith.mulf %7, %8 : vector<128x81xf32>
    %10 = vector.broadcast %4 : vector<1x81xf32> to vector<128x81xf32>
    %11 = arith.addf %10, %9 : vector<128x81xf32>
    %12 = vector.extract_strided_slice %3 {offsets = [0, 1], sizes = [128, 1], strides = [1, 1]} : vector<128x2xf32> to vector<128x1xf32>
    %c1 = arith.constant 1 : index
    %c0_9 = arith.constant 0 : index
    %13 = vector.load %arg4[%c1, %c0_9] : memref<2x81xf32, #tpu.memory_space<vmem>>, vector<1x81xf32>
    %14 = vector.broadcast %12 : vector<128x1xf32> to vector<128x81xf32>
    %15 = vector.broadcast %13 : vector<1x81xf32> to vector<128x81xf32>
    %16 = arith.mulf %14, %15 : vector<128x81xf32>
    %17 = arith.addf %11, %16 : vector<128x81xf32>
    %18 = arith.truncf %17 : vector<128x81xf32> to vector<128x81xbf16>
    %19 = math.tanh %18 : vector<128x81xbf16>
    %20 = arith.extf %19 : vector<128x81xbf16> to vector<128x81xf32>
    %21 = arith.mulf %20, %2 : vector<128x81xf32>
    %22 = arith.addf %21, %0 : vector<128x81xf32>
    %23 = arith.truncf %22 : vector<128x81xf32> to vector<128x81xbf16>
    %c0_10 = arith.constant 0 : index
    %c0_11 = arith.constant 0 : index
    %24 = vector.load %arg6[%c0_10, %c0_11] : memref<81x81xbf16, #tpu.memory_space<vmem>>, vector<81x81xbf16>
    %cst = arith.constant dense<0.000000e+00> : vector<128x81xf32>
    %25 = tpu.matmul %23, %24, %cst {dimension_numbers = #tpu.dot_dimension_numbers<[1], [0], [0], [1], [0, 0, 1, 1], [], []>} : vector<128x81xbf16>, vector<81x81xbf16>, vector<128x81xf32> -> vector<128x81xf32>
    %c0_12 = arith.constant 0 : index
    %c0_13 = arith.constant 0 : index
    %26 = vector.load %arg7[%c0_12, %c0_13] : memref<1x81xf32, #tpu.memory_space<vmem>>, vector<1x81xf32>
    %27 = vector.broadcast %26 : vector<1x81xf32> to vector<128x81xf32>
    %28 = arith.addf %25, %27 : vector<128x81xf32>
    %29 = arith.truncf %28 : vector<128x81xf32> to vector<128x81xbf16>
    %30 = math.tanh %29 : vector<128x81xbf16>
    %31 = arith.extf %30 : vector<128x81xbf16> to vector<128x81xf32>
    %32 = arith.mulf %31, %2 : vector<128x81xf32>
    %33 = arith.addf %32, %0 : vector<128x81xf32>
    %34 = arith.truncf %33 : vector<128x81xf32> to vector<128x81xbf16>
    %c0_14 = arith.constant 0 : index
    %c0_15 = arith.constant 0 : index
    %35 = vector.load %arg8[%c0_14, %c0_15] : memref<81x81xbf16, #tpu.memory_space<vmem>>, vector<81x81xbf16>
    %cst_16 = arith.constant dense<0.000000e+00> : vector<128x81xf32>
    %36 = tpu.matmul %34, %35, %cst_16 {dimension_numbers = #tpu.dot_dimension_numbers<[1], [0], [0], [1], [0, 0, 1, 1], [], []>} : vector<128x81xbf16>, vector<81x81xbf16>, vector<128x81xf32> -> vector<128x81xf32>
    %c0_17 = arith.constant 0 : index
    %c0_18 = arith.constant 0 : index
    %37 = vector.load %arg9[%c0_17, %c0_18] : memref<1x81xf32, #tpu.memory_space<vmem>>, vector<1x81xf32>
    %38 = vector.broadcast %37 : vector<1x81xf32> to vector<128x81xf32>
    %39 = arith.addf %36, %38 : vector<128x81xf32>
    %40 = arith.truncf %39 : vector<128x81xf32> to vector<128x81xbf16>
    %41 = math.tanh %40 : vector<128x81xbf16>
    %42 = arith.extf %41 : vector<128x81xbf16> to vector<128x81xf32>
    %43 = arith.mulf %42, %2 : vector<128x81xf32>
    %44 = arith.addf %43, %0 : vector<128x81xf32>
    %45 = arith.truncf %44 : vector<128x81xf32> to vector<128x81xbf16>
    %c0_19 = arith.constant 0 : index
    %c0_20 = arith.constant 0 : index
    %46 = vector.load %arg10[%c0_19, %c0_20] : memref<81x81xbf16, #tpu.memory_space<vmem>>, vector<81x81xbf16>
    %cst_21 = arith.constant dense<0.000000e+00> : vector<128x81xf32>
    %47 = tpu.matmul %45, %46, %cst_21 {dimension_numbers = #tpu.dot_dimension_numbers<[1], [0], [0], [1], [0, 0, 1, 1], [], []>} : vector<128x81xbf16>, vector<81x81xbf16>, vector<128x81xf32> -> vector<128x81xf32>
    %c0_22 = arith.constant 0 : index
    %c0_23 = arith.constant 0 : index
    %48 = vector.load %arg11[%c0_22, %c0_23] : memref<1x81xf32, #tpu.memory_space<vmem>>, vector<1x81xf32>
    %49 = vector.broadcast %48 : vector<1x81xf32> to vector<128x81xf32>
    %50 = arith.addf %47, %49 : vector<128x81xf32>
    %51 = arith.truncf %50 : vector<128x81xf32> to vector<128x81xbf16>
    %52 = math.tanh %51 : vector<128x81xbf16>
    %53 = arith.extf %52 : vector<128x81xbf16> to vector<128x81xf32>
    %54 = arith.mulf %53, %2 : vector<128x81xf32>
    %55 = arith.addf %54, %0 : vector<128x81xf32>
    %c0_24 = arith.constant 0 : index
    %c0_25 = arith.constant 0 : index
    %56 = vector.load %arg12[%c0_24, %c0_25] : memref<1x81xf32, #tpu.memory_space<vmem>>, vector<1x81xf32>
    %57 = vector.broadcast %56 : vector<1x81xf32> to vector<128x81xf32>
    %58 = arith.mulf %55, %57 : vector<128x81xf32>
    %cst_26 = arith.constant dense<0.000000e+00> : vector<128xf32>
    %59 = vector.multi_reduction <add>, %58, %cst_26 [1] : vector<128x81xf32> to vector<128xf32>
    %60 = vector.shape_cast %59 : vector<128xf32> to vector<128x1xf32>
    %c0_27 = arith.constant 0 : index
    %c0_28 = arith.constant 0 : index
    %61 = vector.load %arg13[%c0_27, %c0_28] : memref<1x1xf32, #tpu.memory_space<vmem>>, vector<1x1xf32>
    %62 = vector.broadcast %61 : vector<1x1xf32> to vector<128x1xf32>
    %63 = arith.addf %60, %62 : vector<128x1xf32>
    %c0_29 = arith.constant 0 : index
    %c0_30 = arith.constant 0 : index
    %64 = vector.load %arg14[%c0_29, %c0_30] : memref<128x1xf32, #tpu.memory_space<vmem>>, vector<128x1xf32>
    tpu.vector_store %arg14[%c0_29, %c0_30], %63 {strides = array<i32>} : memref<128x1xf32, #tpu.memory_space<vmem>>, vector<128x1xf32>,
    return
  }
  func.func @transform_0(%arg0: i32) -> (i32, i32) {
    %c0_i32 = arith.constant 0 : i32
    %c0_i32_0 = arith.constant 0 : i32
    return %arg0, %c0_i32 : i32, i32
  }
  func.func @transform_1(%arg0: i32) -> (i32, i32) {
    %c0_i32 = arith.constant 0 : i32
    %c0_i32_0 = arith.constant 0 : i32
    return %arg0, %c0_i32 : i32, i32
  }
  func.func @transform_2(%arg0: i32) -> (i32, i32) {
    %c0_i32 = arith.constant 0 : i32
    %c0_i32_0 = arith.constant 0 : i32
    return %arg0, %c0_i32 : i32, i32
  }
  func.func @transform_3(%arg0: i32) -> (i32, i32) {
    %c0_i32 = arith.constant 0 : i32
    %c0_i32_0 = arith.constant 0 : i32
    %c0_i32_1 = arith.constant 0 : i32
    return %c0_i32, %c0_i32_0 : i32, i32
  }
  func.func @transform_4(%arg0: i32) -> (i32, i32) {
    %c0_i32 = arith.constant 0 : i32
    %c0_i32_0 = arith.constant 0 : i32
    %c0_i32_1 = arith.constant 0 : i32
    return %c0_i32, %c0_i32_0 : i32, i32
  }
  func.func @transform_5(%arg0: i32) -> (i32, i32) {
    %c0_i32 = arith.constant 0 : i32
    %c0_i32_0 = arith.constant 0 : i32
    %c0_i32_1 = arith.constant 0 : i32
    return %c0_i32, %c0_i32_0 : i32, i32
  }
  func.func @transform_6(%arg0: i32) -> (i32, i32) {
    %c0_i32 = arith.constant 0 : i32
    %c0_i32_0 = arith.constant 0 : i32
    %c0_i32_1 = arith.constant 0 : i32
    return %c0_i32, %c0_i32_0 : i32, i32
  }
  func.func @transform_7(%arg0: i32) -> (i32, i32) {
    %c0_i32 = arith.constant 0 : i32
    %c0_i32_0 = arith.constant 0 : i32
    %c0_i32_1 = arith.constant 0 : i32
    return %c0_i32, %c0_i32_0 : i32, i32
  }
  func.func @transform_8(%arg0: i32) -> (i32, i32) {
    %c0_i32 = arith.constant 0 : i32
    %c0_i32_0 = arith.constant 0 : i32
    %c0_i32_1 = arith.constant 0 : i32
    return %c0_i32, %c0_i32_0 : i32, i32
  }
  func.func @transform_9(%arg0: i32) -> (i32, i32) {
    %c0_i32 = arith.constant 0 : i32
    %c0_i32_0 = arith.constant 0 : i32
    %c0_i32_1 = arith.constant 0 : i32
    return %c0_i32, %c0_i32_0 : i32, i32
  }
  func.func @transform_10(%arg0: i32) -> (i32, i32) {
    %c0_i32 = arith.constant 0 : i32
    %c0_i32_0 = arith.constant 0 : i32
    %c0_i32_1 = arith.constant 0 : i32
    return %c0_i32, %c0_i32_0 : i32, i32
  }
  func.func @transform_11(%arg0: i32) -> (i32, i32) {
    %c0_i32 = arith.constant 0 : i32
    %c0_i32_0 = arith.constant 0 : i32
    %c0_i32_1 = arith.constant 0 : i32
    return %c0_i32, %c0_i32_0 : i32, i32
  }
  func.func @transform_12(%arg0: i32) -> (i32, i32) {
    %c0_i32 = arith.constant 0 : i32
    %c0_i32_0 = arith.constant 0 : i32
    %c0_i32_1 = arith.constant 0 : i32
    return %c0_i32, %c0_i32_0 : i32, i32
  }
  func.func @transform_13(%arg0: i32) -> (i32, i32) {
    %c0_i32 = arith.constant 0 : i32
    %c0_i32_0 = arith.constant 0 : i32
    return %arg0, %c0_i32 : i32, i32
  }
}

</mosaic_0001>

<bundles_post_ra>
// kernel: modified_mlp_forward.1
= control target key start
LH: loop header
LB: loop body
LE: loop exit
PB: predicated region body
PF: predicated region fallthrough
CT: control target
= control target key end

     0   :  { %s2170_s27 = smov 0   ;;  %s2758_s0 = inlined_call_operand.vmem [shape: f32[256,2], index: 0, kind: input, shape index: {}]   ;;  %s2759_s1 = inlined_call_operand.vmem [shape: f32[256,81], index: 1, kind: input, shape index: {}]   ;;  %s2760_s2 = inlined_call_operand.vmem [shape: f32[256,81], index: 2, kind: input, shape index: {}]   ;;  %s2761_s3 = inlined_call_operand.vmem [shape: f32[2,81], index: 3, kind: input, shape index: {}]   ;;  %s2762_s4 = inlined_call_operand.vmem [shape: f32[1,81], index: 4, kind: input, shape index: {}]   ;;  %s2763_s5 = inlined_call_operand.vmem [shape: bf16[81,81], index: 5, kind: input, shape index: {}]   ;;  %s2764_s6 = inlined_call_operand.vmem [shape: f32[1,81], index: 6, kind: input, shape index: {}]   ;;  %s2765_s7 = inlined_call_operand.vmem [shape: bf16[81,81], index: 7, kind: input, shape index: {}]   ;;  %s2766_s8 = inlined_call_operand.vmem [shape: f32[1,81], index: 8, kind: input, shape index: {}]   ;;  %s2767_s9 = inlined_call_operand.vmem [shape: bf16[81,81], index: 9, kind: input, shape index: {}]   ;;  %s2768_s10 = inlined_call_operand.vmem [shape: f32[1,81], index: 10, kind: input, shape index: {}]   ;;  %s2769_s11 = inlined_call_operand.vmem [shape: f32[1,81], index: 11, kind: input, shape index: {}]   ;;  %s2770_s12 = inlined_call_operand.<no memory space> [shape: f32[1,1], index: 12, kind: input, shape index: {}]   ;;  %s2771_s13 = inlined_call_operand.vmem [shape: f32[256,1], index: 13, kind: output, shape index: {}]  }
   0x1   :  { %v18_v0 = vstv %s2770_s12 }
   0x2   :  { %19 = vst [vmem:[#allocation2] sm:$0x1] %v18_v0 }
   0x3 LB: > { %s1780_s28 = sadd.s32 4294967295, %s2093_s27   ;;  %p1784_p0 = scmp.ge.s32.totalorder %s2093_s27, 1  ;;  %s2093_s27 = sphi %s2170_s27, %s25_s27  }
   0x4   : > { %p412_p1 = scmp.lt.s32.totalorder %s2093_s27, 3 }
   0x6   : > { %p413_p2 = pnand %p1784_p0, %p412_p1 }
   0x7   : > { %s1785_s29 = sshll.u32 (!%p413_p2), %s1780_s28, 4  ;;  %v2095_v1 = vmov (!%p413_p2), 0   ;;  %v2096_v8 = vmov (!%p413_p2), 1   ;;  %v2003_v13 = vld [vmem:[%s2763_s5] sm:$0xff] (!%p413_p2)   ;;  %v2004_v14 = vld [vmem:[%s2763_s5 + $0x8] sm:$0xff] (!%p413_p2)   ;;  %v2005_v15 = vld [vmem:[%s2763_s5 + $0x10] sm:$0xff] (!%p413_p2)  }
   0x8   : > { %416 = sbr.rel (%p413_p2) target bundleno = 1121 (0x461), region = 72  ;;  %1994 = vset.pattern.permute.xlu1 (!%p413_p2), %v2095_v1  ;;  %1993 = vset.pattern.permute.xlu0 (!%p413_p2), %v2095_v1  ;;  %p467_p3 = scmp.lt.s32.totalorder (!%p413_p2), %s1785_s29, 31  ;;  %v2006_v17 = vld [vmem:[%s2763_s5 + $0x18] sm:$0xff] (!%p413_p2)   ;;  %v2007_v20 = vld [vmem:[%s2763_s5 + $0x20] sm:$0xff] (!%p413_p2)   ;;  %vm928_vm0 = vcmask (!%p413_p2), 1040384   ;;  %vm903_vm1 = vcmask (!%p413_p2), 662528  }
   0x9   : > { %1887 = vmatprep.subr.bf16.mxu0 (!%p413_p2), %v2003_v13  ;;  %v2008_v22 = vld [vmem:[%s2763_s5 + $0x28] ss:$0 sps:$4 sm:$0x11] (!%p413_p2)   ;;  %v2226_v23 = vsel (!%p413_p2), %vm928_vm0, 65535, %v2095_v1  ;;  %v2239_v35 = vld [vmem:[%s2761_s3] ss:$0 sm:$0xff] (!%p413_p2) }
   0xa   : > { %1888 = vmatpush3.bf16.msra.mxu0 (!%p413_p2), %v2003_v13  ;;  %v932_v24 = vand.u32 (!%p413_p2), %v2008_v22, %v2226_v23  ;;  %v2248_v39 = vld [vmem:[%s2761_s3 + $0x1] ss:$0 sm:$0xff] (!%p413_p2)  ;;  %v2253_v41 = vld [vmem:[%s2762_s4] ss:$0 sm:$0xff] (!%p413_p2)  ;;  %vm1683_vm2 = vcmask (!%p413_p2), 7168  }
   0xb   : > { %1889 = vmatprep.subr.bf16.mxu0 (!%p413_p2), %v2004_v14 }
   0xe   : > { %1890 = vmatpush3.bf16.msra.mxu0 (!%p413_p2), %v2004_v14 }
   0xf   : > { %s2773_s29 = smov (!%p467_p3, %s1785_s29), 31  ;;  %1891 = vmatprep.subr.bf16.mxu0 %v2005_v15 }
  0x10   : > { %s2180_s12 = sshll.u32 %s2773_s29, 3 }
  0x11   : > { %s2186_s15 = scalar_lea.vmem %s2758_s0, %s2180_s12  ;;  %s2273_s20 = scalar_lea.vmem %s2759_s1, %s2180_s12 }
  0x12   : > { %v541_v2 = vld [vmem:[%s2186_s15 + $0x10] sm:$0xff]  ;;  %v539_v3 = vld [vmem:[%s2186_s15] sm:$0xff]  ;;  %v542_v4 = vld [vmem:[%s2186_s15 + $0x18] sm:$0xff]  ;;  %1892 = vmatpush3.bf16.msra.mxu0 %v2005_v15  ;;  %s2279_s23 = scalar_lea.vmem %s2760_s2, %s2180_s12  ;;  %s2721_s28 = scalar_lea.vmem %s2771_s13, %s2180_s12 }
  0x13   : > { %569 = vperm.xlu1 %1994, %v541_v2   ;;  %559 = vperm.xlu0 %1993, %v539_v3   ;;  %v540_v5 = vld [vmem:[%s2186_s15 + $0x8] sm:$0xff]  ;;  %v543_v10 = vld [vmem:[%s2186_s15 + $0x20] sm:$0xff]  ;;  %v545_v11 = vld [vmem:[%s2186_s15 + $0x30] sm:$0xff] }
  0x14   : > { %v544_v6 = vld [vmem:[%s2186_s15 + $0x28] sm:$0xff]  ;;  %v546_v12 = vld [vmem:[%s2186_s15 + $0x38] sm:$0xff]  ;;  %v547_v16 = vld [vmem:[%s2186_s15 + $0x40] sm:$0xff]  ;;  %1893 = vmatprep.subr.bf16.mxu0 %v2006_v17 }
  0x15   : > { %v548_v7 = vld [vmem:[%s2186_s15 + $0x48] sm:$0xff]  ;;  %v550_v18 = vld [vmem:[%s2186_s15 + $0x58] sm:$0xff]  ;;  %v549_v19 = vld [vmem:[%s2186_s15 + $0x50] sm:$0xff] }
  0x16   : > { %v552_v9 = vld [vmem:[%s2186_s15 + $0x68] sm:$0xff]  ;;  %1894 = vmatpush3.bf16.msra.mxu0 %v2006_v17  ;;  %v551_v21 = vld [vmem:[%s2186_s15 + $0x60] sm:$0xff]  ;;  %v554_v25 = vld [vmem:[%s2186_s15 + $0x78] sm:$0xff] }
  0x17   : > { %574 = vperm.xlu1 %1994, %v542_v4   ;;  %564 = vperm.xlu0 %1993, %v540_v5   ;;  %v553_v26 = vld [vmem:[%s2186_s15 + $0x70] sm:$0xff]  ;;  %v507_v13 = vld [vmem:[%s2273_s20] sm:$0xff]  ;;  %v2291_v15 = vld [vmem:[%s2279_s23 + $0x8] sm:$0xff] }
  0x18   : > { %1895 = vmatprep.subr.bf16.mxu0 %v2007_v20 }
  0x1a   : > { %1896 = vmatpush3.bf16.msra.mxu0 %v2007_v20 }
  0x1b   : > { %1995 = vset.pattern.permute.xlu1 %v2096_v8  ;;  %584 = vperm.xlu0 %1993, %v544_v6  }
  0x1c   : > { %685 = vperm.xlu1 %1995, %v540_v5   ;;  %1897 = vmatprep.subr.bf16.mxu0 %v932_v24 }
  0x1e   : > { %1898 = vmatpush3.bf16.msra.mxu0 %v932_v24 }
  0x1f   : > { %604 = vperm.xlu0 %1993, %v548_v7  }
  0x20   : > { %689 = vperm.xlu1 %1995, %v541_v2  }
  0x23   : > { %624 = vperm.xlu0 %1993, %v552_v9  }
  0x24   : > { %1996 = vset.pattern.permute.xlu1 %v2095_v1 }
  0x25   : > { %579 = vperm.xlu1 %1996, %v543_v10  }
  0x27   : > { %2001 = vset.pattern.permute.xlu0 %v2096_v8 }
  0x28   : > { %681 = vperm.xlu0 %2001, %v539_v3  }
  0x29   : > { %589 = vperm.xlu1 %1996, %v545_v11  }
  0x2c   : > { %693 = vperm.xlu0 %2001, %v542_v4  }
  0x2d   : > { %594 = vperm.xlu1 %1996, %v546_v12  }
  0x30   : > { %697 = vperm.xlu0 %2001, %v543_v10  }
  0x31   : > { %1997 = vset.pattern.permute.xlu1 %v2096_v8 }
  0x32   : > { %701 = vperm.xlu1 %1997, %v544_v6  }
  0x34   : > { %709 = vperm.xlu0 %2001, %v546_v12   ;;  %v2287_v12 = vld [vmem:[%s2279_s23] sm:$0xff] }
  0x36   : > { %705 = vperm.xlu1 %1997, %v545_v11  }
  0x38   : > { %713 = vperm.xlu0 %2001, %v547_v16  }
  0x3a   : > { %1998 = vset.pattern.permute.xlu1 %v2095_v1 }
  0x3b   : > { %599 = vperm.xlu1 %1998, %v547_v16   ;;  %v508_v16 = vld [vmem:[%s2273_s20 + $0x8] sm:$0xff] }
  0x3c   : > { %725 = vperm.xlu0 %2001, %v550_v18  }
  0x3f   : > { %609 = vperm.xlu1 %1998, %v549_v19  }
  0x40   : > { %729 = vperm.xlu0 %2001, %v551_v21  }
  0x43   : > { %614 = vperm.xlu1 %1998, %v550_v18  }
  0x44   : > { %741 = vperm.xlu0 %2001, %v554_v25  }
  0x47   : > { %1999 = vset.pattern.permute.xlu1 %v2096_v8 }
  0x48   : > { %717 = vperm.xlu1 %1999, %v548_v7  }
  0x4c   : > { %721 = vperm.xlu1 %1999, %v549_v19  }
  0x50   : > { %2000 = vset.pattern.permute.xlu1 %v2095_v1 }
  0x51   : > { %619 = vperm.xlu1 %2000, %v551_v21   ;;  %v2298_v21 = vsub.f32 %v507_v13, %v2287_v12 }
  0x55   : > { %629 = vperm.xlu1 %2000, %v553_v26  }
  0x59   : > { %634 = vperm.xlu1 %2000, %v554_v25   ;;  %v2301_v25 = vsub.f32 %v508_v16, %v2291_v15 }
  0x5d   : > { %2002 = vset.pattern.permute.xlu1 %v2096_v8 }
  0x5e   : > { %733 = vperm.xlu1 %2002, %v552_v9  }
  0x62   : > { %737 = vperm.xlu1 %2002, %v553_v26   ;;  %v2304_v26 = vld [vmem:[%s2279_s23 + $0x10] sm:$0xff] }
  0x92   : > { %v570_v27 = vpop.permute.xlu1 %569  ;;  %v560_v28 = vpop.permute.xlu0 %559 }
  0x93   : > { %v641_v36 = vmul.f32 %v2239_v35, %v560_v28  ;;  %v643_v45 = vmul.f32 %v2239_v35, %v570_v27  ;;  %v509_v27 = vld [vmem:[%s2273_s20 + $0x10] sm:$0xff] }
  0x95   : > { %v663_v42 = vadd.f32 %v2253_v41, %v641_v36  ;;  %v665_v53 = vadd.f32 %v2253_v41, %v643_v45 }
  0x96   : > { %v575_v29 = vpop.permute.xlu1 %574  ;;  %v565_v30 = vpop.permute.xlu0 %564 }
  0x97   : > { %v642_v37 = vmul.f32 %v2239_v35, %v565_v30  ;;  %v644_v47 = vmul.f32 %v2239_v35, %v575_v29  ;;  %v2308_v29 = vld [vmem:[%s2279_s23 + $0x18] sm:$0xff] }
  0x98   : > { %v510_v30 = vld [vmem:[%s2273_s20 + $0x18] sm:$0xff] }
  0x99   : > { %v664_v43 = vadd.f32 %v2253_v41, %v642_v37  ;;  %v666_v55 = vadd.f32 %v2253_v41, %v644_v47  ;;  %v2312_v37 = vsub.f32 %v509_v27, %v2304_v26 }
  0x9a   : > { %v585_v31 = vpop.permute.xlu0 %584 }
  0x9b   : > { %v686_v32 = vpop.permute.xlu1 %685  ;;  %v646_v56 = vmul.f32 %v2239_v35, %v585_v31 }
  0x9c   : > { %v749_v44 = vmul.f32 %v2248_v39, %v686_v32 }
  0x9d   : > { %v668_v0 = vadd.f32 %v2253_v41, %v646_v56 }
  0x9e   : > { %v2234_v33 = vpop.permute.xlu0 %604  ;;  %v765_v50 = vadd.f32 %v749_v44, %v664_v43  ;;  %v2317_v43 = vsub.f32 %v510_v30, %v2308_v29 }
  0x9f   : > { %v690_v34 = vpop.permute.xlu1 %689 }
  0xa0   : > { %v750_v51 = vmul.f32 %v2248_v39, %v690_v34 }
  0xa2   : > { %v2243_v38 = vpop.permute.xlu0 %624  ;;  %v766_v61 = vadd.f32 %v750_v51, %v665_v53  ;;  %v2325_v51 = vld [vmem:[%s2279_s23 + $0x28] sm:$0xff] }
  0xa3   : > { %v512_v53 = vld [vmem:[%s2273_s20 + $0x28] sm:$0xff] }
  0xa4   : > { %v580_v40 = vpop.permute.xlu1 %579 }
  0xa5   : > { %v645_v60 = vmul.f32 %v2239_v35, %v580_v40 }
  0xa7   : > { %v682_v46 = vpop.permute.xlu0 %681  ;;  %v667_v3 = vadd.f32 %v2253_v41, %v645_v60 }
  0xa8   : > { %v748_v48 = vmul.f32 %v2248_v39, %v682_v46  ;;  %v590_v49 = vpop.permute.xlu1 %589 }
  0xa9   : > { %v647_v5 = vmul.f32 %v2239_v35, %v590_v49 }
  0xaa   : > { %v764_v52 = vadd.f32 %v748_v48, %v663_v42 }
  0xab   : > { %v694_v54 = vpop.permute.xlu0 %693  ;;  %v669_v17 = vadd.f32 %v2253_v41, %v647_v5 }
  0xac   : > { %v780_v57 = vpack.c.bf16 %v765_v50, %v764_v52  ;;  %v751_v58 = vmul.f32 %v2248_v39, %v694_v54  ;;  %v595_v59 = vpop.permute.xlu1 %594  ;;  %v2322_v50 = vld [vmem:[%s2279_s23 + $0x20] sm:$0xff] }
  0xad   : > { %v648_v6 = vmul.f32 %v2239_v35, %v595_v59  ;;  %v511_v52 = vld [vmem:[%s2273_s20 + $0x20] sm:$0xff] }
  0xae   : > { %2021 = vtanh.bf16 %v780_v57  ;;  %v767_v62 = vadd.f32 %v751_v58, %v666_v55 }
  0xaf   : > { %v698_v63 = vpop.permute.xlu0 %697  ;;  %v670_v18 = vadd.f32 %v2253_v41, %v648_v6 }
  0xb0   : > { %v781_v1 = vpack.c.bf16 %v767_v62, %v766_v61  ;;  %v752_v2 = vmul.f32 %v2248_v39, %v698_v63  ;;  %v2336_v62 = vsub.f32 %v511_v52, %v2322_v50  ;;  %v2339_v63 = vsub.f32 %v512_v53, %v2325_v51 }
  0xb1   : > { %v702_v4 = vpop.permute.xlu1 %701 }
  0xb2   : > { %2023 = vtanh.bf16 %v781_v1  ;;  %v753_v7 = vmul.f32 %v2248_v39, %v702_v4  ;;  %v768_v9 = vadd.f32 %v752_v2, %v667_v3  ;;  %v650_v1 = vmul.f32 %v2239_v35, %v2234_v33  ;;  %v2344_v2 = vld [vmem:[%s2279_s23 + $0x30] sm:$0xff] }
  0xb3   : > { %v710_v8 = vpop.permute.xlu0 %709  ;;  %v513_v3 = vld [vmem:[%s2273_s20 + $0x30] sm:$0xff] }
  0xb4   : > { %v769_v10 = vadd.f32 %v753_v7, %v668_v0  ;;  %v755_v11 = vmul.f32 %v2248_v39, %v710_v8  ;;  %v2348_v7 = vld [vmem:[%s2279_s23 + $0x38] sm:$0xff] }
  0xb5   : > { %v706_v14 = vpop.permute.xlu1 %705  ;;  %v514_v8 = vld [vmem:[%s2273_s20 + $0x38] sm:$0xff] }
  0xb6   : > { %v782_v19 = vpack.c.bf16 %v769_v10, %v768_v9  ;;  %v754_v20 = vmul.f32 %v2248_v39, %v706_v14  ;;  %v771_v22 = vadd.f32 %v755_v11, %v670_v18  ;;  %v2358_v14 = vsub.f32 %v513_v3, %v2344_v2 }
  0xb7   : > { %v714_v58 = vpop.permute.xlu0 %713 }
  0xb8   : > { %2025 = vtanh.bf16 %v782_v19  ;;  %v770_v24 = vadd.f32 %v754_v20, %v669_v17  ;;  %v756_v9 = vmul.f32 %v2248_v39, %v714_v58  ;;  %v672_v17 = vadd.f32 %v2253_v41, %v650_v1  ;;  %v516_v1 = vld [vmem:[%s2273_s20 + $0x48] sm:$0xff] }
  0xb9   : > { %v2022_v28 = vpop.eup %2021  ;;  %v2363_v20 = vsub.f32 %v514_v8, %v2348_v7 }
  0xba   : > { %v783_v31 = vpack.c.bf16 %v771_v22, %v770_v24  ;;  %v600_v32 = vpop.permute.xlu1 %599  ;;  %v796_v34 = vunpack.c.l.bf16 %v2022_v28  ;;  %v797_v36 = vunpack.c.h.bf16 %v2022_v28 }
  0xbb   : > { %v649_v57 = vmul.f32 %v2239_v35, %v600_v32  ;;  %v726_v22 = vpop.permute.xlu0 %725 }
  0xbc   : > { %2027 = vtanh.bf16 %v783_v31  ;;  %v812_v40 = vmul.f32 %v796_v34, %v2298_v21  ;;  %v813_v42 = vmul.f32 %v797_v36, %v2301_v25  ;;  %v759_v32 = vmul.f32 %v2248_v39, %v726_v22 }
  0xbd   : > { %v2024_v44 = vpop.eup %2023  ;;  %v671_v10 = vadd.f32 %v2253_v41, %v649_v57 }
  0xbe   : > { %v610_v45 = vpop.permute.xlu1 %609  ;;  %v828_v46 = vadd.f32 %v812_v40, %v2287_v12  ;;  %v829_v47 = vadd.f32 %v813_v42, %v2291_v15  ;;  %v798_v48 = vunpack.c.l.bf16 %v2024_v44  ;;  %v799_v49 = vunpack.c.h.bf16 %v2024_v44 }
  0xbf   : > { %v651_v18 = vmul.f32 %v2239_v35, %v610_v45  ;;  %v772_v31 = vadd.f32 %v756_v9, %v671_v10  ;;  %v654_v10 = vmul.f32 %v2239_v35, %v2243_v38 }
  0xc0   : > { %v844_v54 = vpack.c.bf16 %v829_v47, %v828_v46  ;;  %v814_v55 = vmul.f32 %v798_v48, %v2312_v37  ;;  %v815_v56 = vmul.f32 %v799_v49, %v2317_v43 }
  0xc1   : > { %v673_v47 = vadd.f32 %v2253_v41, %v651_v18  ;;  %v518_v18 = vld [vmem:[%s2273_s20 + $0x58] sm:$0xff] }
  0xc2   : > { %v615_v59 = vpop.permute.xlu1 %614  ;;  %1899 = vmatprep.mubr.msk.bf16.mxu0 %vm903_vm1, %v844_v54  ;;  %v830_v60 = vadd.f32 %v814_v55, %v2304_v26  ;;  %v831_v61 = vadd.f32 %v815_v56, %v2308_v29 }
  0xc3   : > { %v2026_v0 = vpop.eup %2025  ;;  %v652_v11 = vmul.f32 %v2239_v35, %v615_v59 }
  0xc4   : > { %v845_v4 = vpack.c.bf16 %v831_v61, %v830_v60  ;;  %v800_v5 = vunpack.c.l.bf16 %v2026_v0  ;;  %v801_v6 = vunpack.c.h.bf16 %v2026_v0  ;;  %v2379_v60 = vld [vmem:[%s2279_s23 + $0x40] sm:$0xff]  ;;  %v2382_v61 = vld [vmem:[%s2279_s23 + $0x48] sm:$0xff] }
  0xc5   : > { %v674_v36 = vadd.f32 %v2253_v41, %v652_v11  ;;  %v515_v0 = vld [vmem:[%s2273_s20 + $0x40] sm:$0xff]  ;;  %v2391_v8 = vsub.f32 %v516_v1, %v2382_v61  ;;  %v2396_v11 = vld [vmem:[%s2279_s23 + $0x50] sm:$0xff] }
  0xc6   : > { %1900 = vmatmul.mubr.msk.bf16.vlgmr.msra.gmra.mrb[0].mxu0 %vm903_vm1, %v845_v4  ;;  %v816_v13 = vmul.f32 %v800_v5, %v2336_v62  ;;  %v817_v33 = vmul.f32 %v801_v6, %v2339_v63  ;;  %v730_v4 = vpop.permute.xlu0 %729  ;;  %v2388_v6 = vsub.f32 %v515_v0, %v2379_v60 }
  0xc7   : > { %v2028_v16 = vpop.eup %2027  ;;  %v718_v19 = vpop.permute.xlu1 %717  ;;  %v775_v54 = vadd.f32 %v759_v32, %v674_v36 }
  0xc8   : > { %v757_v24 = vmul.f32 %v2248_v39, %v718_v19  ;;  %v832_v27 = vadd.f32 %v816_v13, %v2322_v50  ;;  %v833_v28 = vadd.f32 %v817_v33, %v2325_v51  ;;  %v802_v30 = vunpack.c.l.bf16 %v2028_v16  ;;  %v517_v13 = vld [vmem:[%s2273_s20 + $0x50] sm:$0xff] }
  0xc9   : > { %v803_v34 = vunpack.c.h.bf16 %v2028_v16 }
  0xca   : > { %v773_v40 = vadd.f32 %v757_v24, %v672_v17  ;;  %v846_v42 = vpack.c.bf16 %v833_v28, %v832_v27  ;;  %v818_v44 = vmul.f32 %v802_v30, %v2358_v14  ;;  %v2400_v17 = vld [vmem:[%s2279_s23 + $0x58] sm:$0xff]  ;;  %v2408_v28 = vsub.f32 %v517_v13, %v2396_v11  ;;  %v520_v13 = vld [vmem:[%s2273_s20 + $0x68] sm:$0xff] }
  0xcb   : > { %v722_v45 = vpop.permute.xlu1 %721  ;;  %v819_v46 = vmul.f32 %v803_v34, %v2363_v20  ;;  %v676_v30 = vadd.f32 %v2253_v41, %v654_v10  ;;  %v2414_v36 = vsub.f32 %v518_v18, %v2400_v17  ;;  %v519_v10 = vld [vmem:[%s2273_s20 + $0x60] sm:$0xff]  ;;  %v2444_v18 = vld [vmem:[%s2279_s23 + $0x70] sm:$0xff] }
  0xcc   : > { %v784_v48 = vpack.c.bf16 %v773_v40, %v772_v31  ;;  %v758_v49 = vmul.f32 %v2248_v39, %v722_v45  ;;  %1903 = vmatprep.mubr.msk.bf16.mxu0 %vm903_vm1, %v846_v42  ;;  %v834_v52 = vadd.f32 %v818_v44, %v2344_v2  ;;  %v760_v31 = vmul.f32 %v2248_v39, %v730_v4  ;;  %v742_v40 = vpop.permute.xlu0 %741 }
  0xcd   : > { %v835_v53 = vadd.f32 %v819_v46, %v2348_v7 }
  0xce   : > { %2029 = vtanh.bf16 %v784_v48  ;;  %v774_v55 = vadd.f32 %v758_v49, %v673_v47 }
  0xcf   : > { %v847_v56 = vpack.c.bf16 %v835_v53, %v834_v52 }
  0xd0   : > { %v785_v57 = vpack.c.bf16 %v775_v54, %v774_v55  ;;  %v620_v58 = vpop.permute.xlu1 %619  ;;  %v763_v54 = vmul.f32 %v2248_v39, %v742_v40 }
  0xd1   : > { %1904 = vmatmul.mubr.msk.bf16.gmra.mrb[4].mxu0 %vm903_vm1, %v847_v56  ;;  %v653_v3 = vmul.f32 %v2239_v35, %v620_v58 }
  0xd2   : > { %2031 = vtanh.bf16 %v785_v57 }
  0xd3   : > { %v675_v19 = vadd.f32 %v2253_v41, %v653_v3 }
  0xd4   : > { %v630_v59 = vpop.permute.xlu1 %629 }
  0xd5   : > { %v655_v32 = vmul.f32 %v2239_v35, %v630_v59  ;;  %v776_v47 = vadd.f32 %v760_v31, %v675_v19 }
  0xd7   : > { %v677_v57 = vadd.f32 %v2253_v41, %v655_v32 }
  0xd8   : > { %v635_v5 = vpop.permute.xlu1 %634 }
  0xd9   : > { %v2030_v9 = vpop.eup %2029  ;;  %v656_v22 = vmul.f32 %v2239_v35, %v635_v5 }
  0xda   : > { %v804_v33 = vunpack.c.l.bf16 %v2030_v9  ;;  %v805_v16 = vunpack.c.h.bf16 %v2030_v9 }
  0xdb   : > { %v678_v49 = vadd.f32 %v2253_v41, %v656_v22  ;;  %v2430_v41 = vld [vmem:[%s2279_s23 + $0x60] sm:$0xff]  ;;  %v2447_v22 = vld [vmem:[%s2279_s23 + $0x78] sm:$0xff] }
  0xdc   : > { %v820_v24 = vmul.f32 %v804_v33, %v2388_v6  ;;  %v821_v27 = vmul.f32 %v805_v16, %v2391_v8  ;;  %v2438_v33 = vsub.f32 %v519_v10, %v2430_v41 }
  0xdd   : > { %v2032_v38 = vpop.eup %2031  ;;  %v734_v34 = vpop.permute.xlu1 %733  ;;  %v779_v3 = vadd.f32 %v763_v54, %v678_v49 }
  0xde   : > { %v761_v42 = vmul.f32 %v2248_v39, %v734_v34  ;;  %v836_v44 = vadd.f32 %v820_v24, %v2379_v60  ;;  %v837_v45 = vadd.f32 %v821_v27, %v2382_v61  ;;  %v806_v46 = vunpack.c.l.bf16 %v2032_v38  ;;  %v521_v24 = vld [vmem:[%s2273_s20 + $0x70] sm:$0xff]  ;;  %v522_v27 = vld [vmem:[%s2273_s20 + $0x78] sm:$0xff] }
  0xdf   : > { %v807_v48 = vunpack.c.h.bf16 %v2032_v38  ;;  %v2454_v34 = vsub.f32 %v521_v24, %v2444_v18  ;;  %v2457_v40 = vsub.f32 %v522_v27, %v2447_v22 }
  0xe0   : > { %v777_v52 = vadd.f32 %v761_v42, %v676_v30  ;;  %v848_v53 = vpack.c.bf16 %v837_v45, %v836_v44  ;;  %v822_v35 = vmul.f32 %v806_v46, %v2408_v28 }
  0xe1   : > { %v738_v55 = vpop.permute.xlu1 %737  ;;  %v823_v56 = vmul.f32 %v807_v48, %v2414_v36 }
  0xe2   : > { %v786_v58 = vpack.c.bf16 %v777_v52, %v776_v47  ;;  %v762_v59 = vmul.f32 %v2248_v39, %v738_v55  ;;  %1907 = vmatprep.mubr.msk.bf16.mxu0 %vm903_vm1, %v848_v53  ;;  %v838_v0 = vadd.f32 %v822_v35, %v2396_v11  ;;  %v2433_v39 = vld [vmem:[%s2279_s23 + $0x68] sm:$0xff]  ;;  %v2009_v55 = vld [vmem:[%s2765_s7] sm:$0xff]  }
  0xe3   : > { %v839_v1 = vadd.f32 %v823_v56, %v2400_v17  ;;  %v2441_v16 = vsub.f32 %v520_v13, %v2433_v39  ;;  %1915 = vmatprep.subr.bf16.mxu1 %v2009_v55  ;;  %v2010_v56 = vld [vmem:[%s2765_s7 + $0x8] sm:$0xff]  }
  0xe4   : > { %2033 = vtanh.bf16 %v786_v58  ;;  %v778_v4 = vadd.f32 %v762_v59, %v677_v57  ;;  %1916 = vmatpush3.bf16.msra.mxu1 %v2009_v55  ;;  %v2011_v57 = vld [vmem:[%s2765_s7 + $0x10] sm:$0xff]   ;;  %v2012_v58 = vld [vmem:[%s2765_s7 + $0x18] sm:$0xff]   ;;  %v2013_v59 = vld [vmem:[%s2765_s7 + $0x20] sm:$0xff]  }
  0xe5   : > { %v849_v5 = vpack.c.bf16 %v839_v1, %v838_v0  ;;  %1917 = vmatprep.subr.bf16.mxu1 %v2010_v56  ;;  %v2014_v0 = vld [vmem:[%s2765_s7 + $0x28] ss:$0 sps:$4 sm:$0x11]  }
  0xe6   : > { %v787_v9 = vpack.c.bf16 %v779_v3, %v778_v4  ;;  %v1179_v1 = vand.u32 %v2014_v0, %v2226_v23  ;;  %v2489_v4 = vld [vmem:[%s2764_s6] ss:$0 sm:$0xff] }
  0xe7   : > { %1908 = vmatmul.mubr.msk.bf16.gmra.mrb[8].mxu0 %vm903_vm1, %v849_v5 }
  0xe8   : > { %2035 = vtanh.bf16 %v787_v9  ;;  %1918 = vmatpush3.bf16.msra.mxu1 %v2010_v56 }
  0xe9   : > { %1919 = vmatprep.subr.bf16.mxu1 %v2011_v57 }
  0xec   : > { %1920 = vmatpush3.bf16.msra.mxu1 %v2011_v57 }
  0xed   : > { %1921 = vmatprep.subr.bf16.mxu1 %v2012_v58 }
  0xef   : > { %v2034_v19 = vpop.eup %2033 }
  0xf0   : > { %v808_v38 = vunpack.c.l.bf16 %v2034_v19  ;;  %v809_v30 = vunpack.c.h.bf16 %v2034_v19  ;;  %1922 = vmatpush3.bf16.msra.mxu1 %v2012_v58 }
  0xf1   : > { %1923 = vmatprep.subr.bf16.mxu1 %v2013_v59 }
  0xf2   : > { %v824_v31 = vmul.f32 %v808_v38, %v2438_v33  ;;  %v825_v32 = vmul.f32 %v809_v30, %v2441_v16 }
  0xf3   : > { %v2036_v42 = vpop.eup %2035 }
  0xf4   : > { %v840_v44 = vadd.f32 %v824_v31, %v2430_v41  ;;  %v841_v45 = vadd.f32 %v825_v32, %v2433_v39  ;;  %v810_v46 = vunpack.c.l.bf16 %v2036_v42  ;;  %v811_v47 = vunpack.c.h.bf16 %v2036_v42  ;;  %1924 = vmatpush3.bf16.msra.mxu1 %v2013_v59 }
  0xf5   : > { %1925 = vmatprep.subr.bf16.mxu1 %v1179_v1 }
  0xf6   : > { %v850_v48 = vpack.c.bf16 %v841_v45, %v840_v44  ;;  %v826_v49 = vmul.f32 %v810_v46, %v2454_v34  ;;  %v827_v52 = vmul.f32 %v811_v47, %v2457_v40 }
  0xf8   : > { %1911 = vmatprep.mubr.msk.bf16.mxu0 %vm903_vm1, %v850_v48  ;;  %v842_v53 = vadd.f32 %v826_v49, %v2444_v18  ;;  %v843_v35 = vadd.f32 %v827_v52, %v2447_v22  ;;  %1926 = vmatpush3.bf16.msra.mxu1 %v1179_v1 }
  0xfa   : > { %v851_v54 = vpack.c.bf16 %v843_v35, %v842_v53 }
  0xfc   : > { %1912 = vmatmul.mubr.msk.bf16.gmra.mrb[12].mxu0 %vm903_vm1, %v851_v54 }
 0x199   : > { %v1901_v3 = vpop.f32.mrb[0].mxu0 }
 0x19a   : > { %v968_v5 = vpop.f32.mrb[1].mxu0  ;;  %v977_v10 = vadd.f32 %v1901_v3, %v2489_v4 }
 0x19b   : > { %v1902_v9 = vpop.f32.mrb[2].mxu0  ;;  %v969_v24 = vadd.f32 %v2489_v4, %v968_v5 }
 0x19c   : > { %v980_v13 = vadd.f32 %v1902_v9, %v2489_v4  ;;  %v971_v19 = vpop.f32.mrb[3].mxu0 }
 0x19d   : > { %v972_v27 = vadd.f32 %v2489_v4, %v971_v19 }
 0x19e   : > { %v1032_v38 = vpack.c.bf16 %v980_v13, %v977_v10 }
 0x19f   : > { %v1031_v30 = vpack.c.bf16 %v972_v27, %v969_v24 }
 0x1a0   : > { %2037 = vtanh.bf16 %v1032_v38 }
 0x1a1   : > { %2039 = vtanh.bf16 %v1031_v30 }
 0x1a4   : > { %v1905_v31 = vpop.f32.mrb[4].mxu0 }
 0x1a5   : > { %v984_v32 = vpop.f32.mrb[5].mxu0  ;;  %v993_v44 = vadd.f32 %v1905_v31, %v2489_v4 }
 0x1a6   : > { %v1906_v42 = vpop.f32.mrb[6].mxu0  ;;  %v985_v47 = vadd.f32 %v2489_v4, %v984_v32 }
 0x1a7   : > { %v996_v45 = vadd.f32 %v1906_v42, %v2489_v4  ;;  %v987_v46 = vpop.f32.mrb[7].mxu0 }
 0x1a8   : > { %v988_v48 = vadd.f32 %v2489_v4, %v987_v46 }
 0x1a9   : > { %v1034_v49 = vpack.c.bf16 %v996_v45, %v993_v44 }
 0x1aa   : > { %v1033_v52 = vpack.c.bf16 %v988_v48, %v985_v47 }
 0x1ab   : > { %v2038_v53 = vpop.eup %2037  ;;  %2041 = vtanh.bf16 %v1034_v49 }
 0x1ac   : > { %v2040_v35 = vpop.eup %2039  ;;  %2043 = vtanh.bf16 %v1033_v52  ;;  %v1049_v54 = vunpack.c.l.bf16 %v2038_v53  ;;  %v1050_v55 = vunpack.c.h.bf16 %v2038_v53 }
 0x1ad   : > { %v1047_v56 = vunpack.c.l.bf16 %v2040_v35  ;;  %v1048_v57 = vunpack.c.h.bf16 %v2040_v35 }
 0x1ae   : > { %v1065_v58 = vmul.f32 %v1049_v54, %v2312_v37  ;;  %v1066_v59 = vmul.f32 %v1050_v55, %v2317_v43 }
 0x1af   : > { %v1063_v0 = vmul.f32 %v1047_v56, %v2298_v21  ;;  %v1064_v1 = vmul.f32 %v1048_v57, %v2301_v25 }
 0x1b0   : > { %v1081_v3 = vadd.f32 %v1065_v58, %v2304_v26  ;;  %v1082_v5 = vadd.f32 %v1066_v59, %v2308_v29 }
 0x1b1   : > { %v1079_v9 = vadd.f32 %v1063_v0, %v2287_v12  ;;  %v1080_v10 = vadd.f32 %v1064_v1, %v2291_v15 }
 0x1b2   : > { %v1096_v19 = vpack.c.bf16 %v1082_v5, %v1081_v3 }
 0x1b3   : > { %v1095_v13 = vpack.c.bf16 %v1080_v10, %v1079_v9 }
 0x1b5   : > { %1927 = vmatprep.mubr.msk.bf16.mxu1 %vm903_vm1, %v1095_v13 }
 0x1b6   : > { %v2042_v24 = vpop.eup %2041  ;;  %1928 = vmatmul.mubr.msk.bf16.vlgmr.msra.gmra.mrb[0].mxu1 %vm903_vm1, %v1096_v19 }
 0x1b7   : > { %v2044_v27 = vpop.eup %2043  ;;  %v1053_v38 = vunpack.c.l.bf16 %v2042_v24  ;;  %v1054_v30 = vunpack.c.h.bf16 %v2042_v24 }
 0x1b8   : > { %v1051_v31 = vunpack.c.l.bf16 %v2044_v27  ;;  %v1052_v32 = vunpack.c.h.bf16 %v2044_v27 }
 0x1b9   : > { %v1069_v42 = vmul.f32 %v1053_v38, %v2358_v14  ;;  %v1070_v44 = vmul.f32 %v1054_v30, %v2363_v20 }
 0x1ba   : > { %v1909_v45 = vpop.f32.mrb[8].mxu0  ;;  %v1067_v46 = vmul.f32 %v1051_v31, %v2336_v62  ;;  %v1068_v47 = vmul.f32 %v1052_v32, %v2339_v63 }
 0x1bb   : > { %v1000_v48 = vpop.f32.mrb[9].mxu0  ;;  %v1085_v49 = vadd.f32 %v1069_v42, %v2344_v2  ;;  %v1086_v52 = vadd.f32 %v1070_v44, %v2348_v7  ;;  %v1009_v55 = vadd.f32 %v1909_v45, %v2489_v4 }
 0x1bc   : > { %v1910_v53 = vpop.f32.mrb[10].mxu0  ;;  %v1083_v35 = vadd.f32 %v1067_v46, %v2322_v50  ;;  %v1084_v54 = vadd.f32 %v1068_v47, %v2325_v51  ;;  %v1001_v58 = vadd.f32 %v2489_v4, %v1000_v48 }
 0x1bd   : > { %v1012_v56 = vadd.f32 %v1910_v53, %v2489_v4  ;;  %v1003_v57 = vpop.f32.mrb[11].mxu0  ;;  %v1098_v3 = vpack.c.bf16 %v1086_v52, %v1085_v49 }
 0x1be   : > { %v1004_v59 = vadd.f32 %v2489_v4, %v1003_v57  ;;  %v1097_v0 = vpack.c.bf16 %v1084_v54, %v1083_v35 }
 0x1bf   : > { %v1036_v1 = vpack.c.bf16 %v1012_v56, %v1009_v55 }
 0x1c0   : > { %v1035_v5 = vpack.c.bf16 %v1004_v59, %v1001_v58  ;;  %1931 = vmatprep.mubr.msk.bf16.mxu1 %vm903_vm1, %v1097_v0 }
 0x1c1   : > { %2045 = vtanh.bf16 %v1036_v1  ;;  %1932 = vmatmul.mubr.msk.bf16.gmra.mrb[4].mxu1 %vm903_vm1, %v1098_v3 }
 0x1c2   : > { %2047 = vtanh.bf16 %v1035_v5 }
 0x1cc   : > { %v2046_v9 = vpop.eup %2045 }
 0x1cd   : > { %v2048_v10 = vpop.eup %2047  ;;  %v1057_v13 = vunpack.c.l.bf16 %v2046_v9  ;;  %v1058_v19 = vunpack.c.h.bf16 %v2046_v9 }
 0x1ce   : > { %v1055_v24 = vunpack.c.l.bf16 %v2048_v10  ;;  %v1056_v27 = vunpack.c.h.bf16 %v2048_v10 }
 0x1cf   : > { %v1913_v38 = vpop.f32.mrb[12].mxu0  ;;  %v1073_v30 = vmul.f32 %v1057_v13, %v2408_v28  ;;  %v1074_v31 = vmul.f32 %v1058_v19, %v2414_v36 }
 0x1d0   : > { %v1016_v32 = vpop.f32.mrb[13].mxu0  ;;  %v1071_v42 = vmul.f32 %v1055_v24, %v2388_v6  ;;  %v1072_v44 = vmul.f32 %v1056_v27, %v2391_v8  ;;  %v1025_v48 = vadd.f32 %v1913_v38, %v2489_v4 }
 0x1d1   : > { %v1914_v45 = vpop.f32.mrb[14].mxu0  ;;  %v1089_v46 = vadd.f32 %v1073_v30, %v2396_v11  ;;  %v1090_v47 = vadd.f32 %v1074_v31, %v2400_v17  ;;  %v1017_v54 = vadd.f32 %v2489_v4, %v1016_v32 }
 0x1d2   : > { %v1028_v49 = vadd.f32 %v1914_v45, %v2489_v4  ;;  %v1019_v52 = vpop.f32.mrb[15].mxu0  ;;  %v1087_v53 = vadd.f32 %v1071_v42, %v2379_v60  ;;  %v1088_v35 = vadd.f32 %v1072_v44, %v2382_v61  ;;  %v2015_v44 = vld [vmem:[%s2767_s9] sm:$0xff]   ;;  %v2016_v45 = vld [vmem:[%s2767_s9 + $0x8] sm:$0xff]  }
 0x1d3   : > { %v1020_v55 = vadd.f32 %v2489_v4, %v1019_v52  ;;  %v1100_v59 = vpack.c.bf16 %v1090_v47, %v1089_v46  ;;  %1943 = vmatprep.subr.bf16.mxu0 %v2015_v44  ;;  %1971 = vmatprep.subr.bf16.mxu1 %v2015_v44  ;;  %v2017_v46 = vld [vmem:[%s2767_s9 + $0x10] sm:$0xff]   ;;  %v2018_v47 = vld [vmem:[%s2767_s9 + $0x18] sm:$0xff]  }
 0x1d4   : > { %v1038_v56 = vpack.c.bf16 %v1028_v49, %v1025_v48  ;;  %v1099_v57 = vpack.c.bf16 %v1088_v35, %v1087_v53  ;;  %1944 = vmatpush3.bf16.msra.mxu0 %v2015_v44  ;;  %1977 = vmatpush3.bf16.msra.mxu1 %v2015_v44  ;;  %v2019_v48 = vld [vmem:[%s2767_s9 + $0x20] sm:$0xff]   ;;  %v2020_v49 = vld [vmem:[%s2767_s9 + $0x28] ss:$0 sps:$4 sm:$0x11]  }
 0x1d5   : > { %v1037_v58 = vpack.c.bf16 %v1020_v55, %v1017_v54  ;;  %1945 = vmatprep.subr.bf16.mxu0 %v2016_v45  ;;  %1972 = vmatprep.subr.bf16.mxu1 %v2016_v45  ;;  %v1426_v52 = vand.u32 %v2020_v49, %v2226_v23  ;;  %v2569_v35 = vld [vmem:[%s2766_s8] ss:$0 sm:$0xff] }
 0x1d6   : > { %2049 = vtanh.bf16 %v1038_v56  ;;  %1935 = vmatprep.mubr.msk.bf16.mxu1 %vm903_vm1, %v1099_v57 }
 0x1d7   : > { %2051 = vtanh.bf16 %v1037_v58  ;;  %1936 = vmatmul.mubr.msk.bf16.gmra.mrb[8].mxu1 %vm903_vm1, %v1100_v59 }
 0x1d8   : > { %1946 = vmatpush3.bf16.msra.mxu0 %v2016_v45  ;;  %1978 = vmatpush3.bf16.msra.mxu1 %v2016_v45 }
 0x1d9   : > { %1947 = vmatprep.subr.bf16.mxu0 %v2017_v46  ;;  %1973 = vmatprep.subr.bf16.mxu1 %v2017_v46 }
 0x1dc   : > { %1948 = vmatpush3.bf16.msra.mxu0 %v2017_v46  ;;  %1979 = vmatpush3.bf16.msra.mxu1 %v2017_v46 }
 0x1dd   : > { %1949 = vmatprep.subr.bf16.mxu0 %v2018_v47  ;;  %1974 = vmatprep.subr.bf16.mxu1 %v2018_v47 }
 0x1e0   : > { %1950 = vmatpush3.bf16.msra.mxu0 %v2018_v47  ;;  %1980 = vmatpush3.bf16.msra.mxu1 %v2018_v47 }
 0x1e1   : > { %v2050_v0 = vpop.eup %2049  ;;  %1951 = vmatprep.subr.bf16.mxu0 %v2019_v48  ;;  %1975 = vmatprep.subr.bf16.mxu1 %v2019_v48 }
 0x1e2   : > { %v2052_v1 = vpop.eup %2051  ;;  %v1061_v3 = vunpack.c.l.bf16 %v2050_v0  ;;  %v1062_v5 = vunpack.c.h.bf16 %v2050_v0 }
 0x1e3   : > { %v1059_v9 = vunpack.c.l.bf16 %v2052_v1  ;;  %v1060_v10 = vunpack.c.h.bf16 %v2052_v1 }
 0x1e4   : > { %v1077_v13 = vmul.f32 %v1061_v3, %v2454_v34  ;;  %v1078_v4 = vmul.f32 %v1062_v5, %v2457_v40  ;;  %1952 = vmatpush3.bf16.msra.mxu0 %v2019_v48  ;;  %1981 = vmatpush3.bf16.msra.mxu1 %v2019_v48 }
 0x1e5   : > { %v1075_v19 = vmul.f32 %v1059_v9, %v2438_v33  ;;  %v1076_v24 = vmul.f32 %v1060_v10, %v2441_v16  ;;  %1953 = vmatprep.subr.bf16.mxu0 %v1426_v52  ;;  %1976 = vmatprep.subr.bf16.mxu1 %v1426_v52 }
 0x1e6   : > { %v1093_v27 = vadd.f32 %v1077_v13, %v2444_v18  ;;  %v1094_v38 = vadd.f32 %v1078_v4, %v2447_v22 }
 0x1e7   : > { %v1091_v30 = vadd.f32 %v1075_v19, %v2430_v41  ;;  %v1092_v31 = vadd.f32 %v1076_v24, %v2433_v39 }
 0x1e8   : > { %v1102_v42 = vpack.c.bf16 %v1094_v38, %v1093_v27  ;;  %1954 = vmatpush3.bf16.msra.mxu0 %v1426_v52  ;;  %1982 = vmatpush3.bf16.msra.mxu1 %v1426_v52 }
 0x1e9   : > { %v1101_v32 = vpack.c.bf16 %v1092_v31, %v1091_v30 }
 0x1eb   : > { %1939 = vmatprep.mubr.msk.bf16.mxu1 %vm903_vm1, %v1101_v32 }
 0x1ec   : > { %1940 = vmatmul.mubr.msk.bf16.gmra.mrb[12].mxu1 %vm903_vm1, %v1102_v42 }
 0x289   : > { %v1929_v53 = vpop.f32.mrb[0].mxu1 }
 0x28a   : > { %v1215_v54 = vpop.f32.mrb[1].mxu1  ;;  %v1224_v56 = vadd.f32 %v1929_v53, %v2569_v35 }
 0x28b   : > { %v1930_v55 = vpop.f32.mrb[2].mxu1  ;;  %v1216_v59 = vadd.f32 %v2569_v35, %v1215_v54 }
 0x28c   : > { %v1227_v57 = vadd.f32 %v1930_v55, %v2569_v35  ;;  %v1218_v58 = vpop.f32.mrb[3].mxu1 }
 0x28d   : > { %v1219_v23 = vadd.f32 %v2569_v35, %v1218_v58 }
 0x28e   : > { %v1279_v0 = vpack.c.bf16 %v1227_v57, %v1224_v56 }
 0x28f   : > { %v1278_v1 = vpack.c.bf16 %v1219_v23, %v1216_v59 }
 0x290   : > { %2053 = vtanh.bf16 %v1279_v0 }
 0x291   : > { %2055 = vtanh.bf16 %v1278_v1 }
 0x294   : > { %v1933_v3 = vpop.f32.mrb[4].mxu1 }
 0x295   : > { %v1231_v5 = vpop.f32.mrb[5].mxu1  ;;  %v1240_v10 = vadd.f32 %v1933_v3, %v2569_v35 }
 0x296   : > { %v1934_v9 = vpop.f32.mrb[6].mxu1  ;;  %v1232_v19 = vadd.f32 %v2569_v35, %v1231_v5 }
 0x297   : > { %v1243_v13 = vadd.f32 %v1934_v9, %v2569_v35  ;;  %v1234_v4 = vpop.f32.mrb[7].mxu1 }
 0x298   : > { %v1235_v24 = vadd.f32 %v2569_v35, %v1234_v4 }
 0x299   : > { %v1281_v27 = vpack.c.bf16 %v1243_v13, %v1240_v10 }
 0x29a   : > { %v1280_v38 = vpack.c.bf16 %v1235_v24, %v1232_v19 }
 0x29b   : > { %v2054_v30 = vpop.eup %2053  ;;  %2057 = vtanh.bf16 %v1281_v27 }
 0x29c   : > { %v2056_v31 = vpop.eup %2055  ;;  %v1296_v32 = vunpack.c.l.bf16 %v2054_v30  ;;  %v1297_v42 = vunpack.c.h.bf16 %v2054_v30  ;;  %2059 = vtanh.bf16 %v1280_v38 }
 0x29d   : > { %v1294_v44 = vunpack.c.l.bf16 %v2056_v31  ;;  %v1295_v45 = vunpack.c.h.bf16 %v2056_v31 }
 0x29e   : > { %v1312_v46 = vmul.f32 %v1296_v32, %v2312_v37  ;;  %v1313_v47 = vmul.f32 %v1297_v42, %v2317_v43 }
 0x29f   : > { %v1310_v48 = vmul.f32 %v1294_v44, %v2298_v21  ;;  %v1311_v49 = vmul.f32 %v1295_v45, %v2301_v25 }
 0x2a0   : > { %v1328_v52 = vadd.f32 %v1312_v46, %v2304_v26  ;;  %v1329_v53 = vadd.f32 %v1313_v47, %v2308_v29 }
 0x2a1   : > { %v1326_v54 = vadd.f32 %v1310_v48, %v2287_v12  ;;  %v1327_v55 = vadd.f32 %v1311_v49, %v2291_v15 }
 0x2a2   : > { %v1343_v57 = vpack.c.bf16 %v1329_v53, %v1328_v52 }
 0x2a3   : > { %v1342_v56 = vpack.c.bf16 %v1327_v55, %v1326_v54 }
 0x2a5   : > { %1955 = vmatprep.mubr.msk.bf16.mxu0 %vm903_vm1, %v1342_v56 }
 0x2a6   : > { %v2058_v58 = vpop.eup %2057  ;;  %1956 = vmatmul.mubr.msk.bf16.vlgmr.msra.gmra.mrb[16].mxu0 %vm903_vm1, %v1343_v57 }
 0x2a7   : > { %v2060_v59 = vpop.eup %2059  ;;  %v1300_v23 = vunpack.c.l.bf16 %v2058_v58  ;;  %v1301_v0 = vunpack.c.h.bf16 %v2058_v58 }
 0x2a8   : > { %v1298_v1 = vunpack.c.l.bf16 %v2060_v59  ;;  %v1299_v3 = vunpack.c.h.bf16 %v2060_v59 }
 0x2a9   : > { %v1316_v5 = vmul.f32 %v1300_v23, %v2358_v14  ;;  %v1317_v9 = vmul.f32 %v1301_v0, %v2363_v20 }
 0x2aa   : > { %v1937_v10 = vpop.f32.mrb[8].mxu1  ;;  %v1314_v12 = vmul.f32 %v1298_v1, %v2336_v62  ;;  %v1315_v15 = vmul.f32 %v1299_v3, %v2339_v63 }
 0x2ab   : > { %v1247_v13 = vpop.f32.mrb[9].mxu1  ;;  %v1332_v4 = vadd.f32 %v1316_v5, %v2344_v2  ;;  %v1333_v19 = vadd.f32 %v1317_v9, %v2348_v7  ;;  %v1256_v30 = vadd.f32 %v1937_v10, %v2569_v35 }
 0x2ac   : > { %v1938_v24 = vpop.f32.mrb[10].mxu1  ;;  %v1330_v27 = vadd.f32 %v1314_v12, %v2322_v50  ;;  %v1331_v38 = vadd.f32 %v1315_v15, %v2325_v51  ;;  %v1248_v42 = vadd.f32 %v2569_v35, %v1247_v13 }
 0x2ad   : > { %v1259_v31 = vadd.f32 %v1938_v24, %v2569_v35  ;;  %v1250_v32 = vpop.f32.mrb[11].mxu1  ;;  %v1345_v47 = vpack.c.bf16 %v1333_v19, %v1332_v4 }
 0x2ae   : > { %v1251_v44 = vadd.f32 %v2569_v35, %v1250_v32  ;;  %v1344_v45 = vpack.c.bf16 %v1331_v38, %v1330_v27 }
 0x2af   : > { %v1283_v46 = vpack.c.bf16 %v1259_v31, %v1256_v30 }
 0x2b0   : > { %v1282_v48 = vpack.c.bf16 %v1251_v44, %v1248_v42  ;;  %1959 = vmatprep.mubr.msk.bf16.mxu0 %vm903_vm1, %v1344_v45 }
 0x2b1   : > { %2061 = vtanh.bf16 %v1283_v46  ;;  %1960 = vmatmul.mubr.msk.bf16.gmra.mrb[20].mxu0 %vm903_vm1, %v1345_v47 }
 0x2b2   : > { %2063 = vtanh.bf16 %v1282_v48 }
 0x2bc   : > { %v2062_v49 = vpop.eup %2061 }
 0x2bd   : > { %v2064_v52 = vpop.eup %2063  ;;  %v1304_v53 = vunpack.c.l.bf16 %v2062_v49  ;;  %v1305_v54 = vunpack.c.h.bf16 %v2062_v49 }
 0x2be   : > { %v1302_v55 = vunpack.c.l.bf16 %v2064_v52  ;;  %v1303_v56 = vunpack.c.h.bf16 %v2064_v52 }
 0x2bf   : > { %v1320_v57 = vmul.f32 %v1304_v53, %v2408_v28  ;;  %v1321_v58 = vmul.f32 %v1305_v54, %v2414_v36  ;;  %v1941_v59 = vpop.f32.mrb[12].mxu1 }
 0x2c0   : > { %v1263_v23 = vpop.f32.mrb[13].mxu1  ;;  %v1318_v0 = vmul.f32 %v1302_v55, %v2388_v6  ;;  %v1319_v1 = vmul.f32 %v1303_v56, %v2391_v8  ;;  %v1272_v10 = vadd.f32 %v1941_v59, %v2569_v35 }
 0x2c1   : > { %v1336_v3 = vadd.f32 %v1320_v57, %v2396_v11  ;;  %v1337_v5 = vadd.f32 %v1321_v58, %v2400_v17  ;;  %v1942_v9 = vpop.f32.mrb[14].mxu1  ;;  %v1264_v19 = vadd.f32 %v2569_v35, %v1263_v23  ;;  %v2630_v23 = vld [vmem:[%s2768_s10] ss:$0 sm:$0xff] }
 0x2c2   : > { %v1275_v12 = vadd.f32 %v1942_v9, %v2569_v35  ;;  %v1266_v15 = vpop.f32.mrb[15].mxu1  ;;  %v1334_v13 = vadd.f32 %v1318_v0, %v2379_v60  ;;  %v1335_v4 = vadd.f32 %v1319_v1, %v2382_v61 }
 0x2c3   : > { %v1267_v24 = vadd.f32 %v2569_v35, %v1266_v15  ;;  %v1347_v31 = vpack.c.bf16 %v1337_v5, %v1336_v3 }
 0x2c4   : > { %v1285_v27 = vpack.c.bf16 %v1275_v12, %v1272_v10  ;;  %v1346_v38 = vpack.c.bf16 %v1335_v4, %v1334_v13 }
 0x2c5   : > { %v1284_v30 = vpack.c.bf16 %v1267_v24, %v1264_v19 }
 0x2c6   : > { %2065 = vtanh.bf16 %v1285_v27  ;;  %1963 = vmatprep.mubr.msk.bf16.mxu1 %vm903_vm1, %v1346_v38 }
 0x2c7   : > { %2067 = vtanh.bf16 %v1284_v30  ;;  %1964 = vmatmul.mubr.msk.bf16.vlgmr.msra.gmra.mrb[16].mxu1 %vm903_vm1, %v1347_v31 }
 0x2d1   : > { %v2066_v32 = vpop.eup %2065 }
 0x2d2   : > { %v2068_v42 = vpop.eup %2067  ;;  %v1308_v44 = vunpack.c.l.bf16 %v2066_v32  ;;  %v1309_v45 = vunpack.c.h.bf16 %v2066_v32 }
 0x2d3   : > { %v1306_v46 = vunpack.c.l.bf16 %v2068_v42  ;;  %v1307_v47 = vunpack.c.h.bf16 %v2068_v42 }
 0x2d4   : > { %v1324_v48 = vmul.f32 %v1308_v44, %v2454_v34  ;;  %v1325_v35 = vmul.f32 %v1309_v45, %v2457_v40 }
 0x2d5   : > { %v1322_v49 = vmul.f32 %v1306_v46, %v2438_v33  ;;  %v1323_v52 = vmul.f32 %v1307_v47, %v2441_v16 }
 0x2d6   : > { %v1340_v53 = vadd.f32 %v1324_v48, %v2444_v18  ;;  %v1341_v54 = vadd.f32 %v1325_v35, %v2447_v22 }
 0x2d7   : > { %v1338_v55 = vadd.f32 %v1322_v49, %v2430_v41  ;;  %v1339_v56 = vadd.f32 %v1323_v52, %v2433_v39 }
 0x2d8   : > { %v1349_v58 = vpack.c.bf16 %v1341_v54, %v1340_v53  ;;  %v2645_v54 = vld [vmem:[%s2769_s11] ss:$0 sm:$0xff] }
 0x2d9   : > { %v1348_v57 = vpack.c.bf16 %v1339_v56, %v1338_v55 }
 0x2db   : > { %1967 = vmatprep.mubr.msk.bf16.mxu1 %vm903_vm1, %v1348_v57 }
 0x2dc   : > { %1968 = vmatmul.mubr.msk.bf16.gmra.mrb[20].mxu1 %vm903_vm1, %v1349_v58 }
 0x379   : > { %v1957_v59 = vpop.f32.mrb[16].mxu0 }
 0x37a   : > { %v1462_v0 = vpop.f32.mrb[17].mxu0  ;;  %v1471_v3 = vadd.f32 %v1957_v59, %v2630_v23  ;;  %v2085_v59 = vld [vmem:[%s2279_s23 + $0x8] sm:$0xff] }
 0x37b   : > { %v1958_v1 = vpop.f32.mrb[18].mxu0  ;;  %v1463_v10 = vadd.f32 %v2630_v23, %v1462_v0 }
 0x37c   : > { %v1474_v5 = vadd.f32 %v1958_v1, %v2630_v23  ;;  %v1465_v9 = vpop.f32.mrb[19].mxu0  ;;  %v2086_v1 = vld [vmem:[%s2279_s23] sm:$0xff] }
 0x37d   : > { %v1466_v12 = vadd.f32 %v2630_v23, %v1465_v9 }
 0x37e   : > { %v1526_v15 = vpack.c.bf16 %v1474_v5, %v1471_v3 }
 0x37f   : > { %v1525_v13 = vpack.c.bf16 %v1466_v12, %v1463_v10 }
 0x380   : > { %2069 = vtanh.bf16 %v1526_v15 }
 0x381   : > { %2071 = vtanh.bf16 %v1525_v13 }
 0x384   : > { %v1961_v4 = vpop.f32.mrb[20].mxu0 }
 0x385   : > { %v1478_v19 = vpop.f32.mrb[21].mxu0  ;;  %v1487_v27 = vadd.f32 %v1961_v4, %v2630_v23 }
 0x386   : > { %v1962_v24 = vpop.f32.mrb[22].mxu0  ;;  %v1479_v31 = vadd.f32 %v2630_v23, %v1478_v19 }
 0x387   : > { %v1490_v38 = vadd.f32 %v1962_v24, %v2630_v23  ;;  %v1481_v30 = vpop.f32.mrb[23].mxu0 }
 0x388   : > { %v1482_v32 = vadd.f32 %v2630_v23, %v1481_v30 }
 0x389   : > { %v1528_v42 = vpack.c.bf16 %v1490_v38, %v1487_v27 }
 0x38a   : > { %v1527_v44 = vpack.c.bf16 %v1482_v32, %v1479_v31 }
 0x38b   : > { %v2070_v45 = vpop.eup %2069  ;;  %2073 = vtanh.bf16 %v1528_v42 }
 0x38c   : > { %v2072_v46 = vpop.eup %2071  ;;  %2075 = vtanh.bf16 %v1527_v44  ;;  %v1544_v47 = vunpack.c.h.bf16 %v2070_v45  ;;  %v1543_v48 = vunpack.c.l.bf16 %v2070_v45 }
 0x38d   : > { %v1542_v35 = vunpack.c.h.bf16 %v2072_v46  ;;  %v1541_v49 = vunpack.c.l.bf16 %v2072_v46 }
 0x38e   : > { %v1560_v52 = vmul.f32 %v1544_v47, %v2317_v43  ;;  %v1559_v53 = vmul.f32 %v1543_v48, %v2312_v37 }
 0x38f   : > { %v1558_v55 = vmul.f32 %v1542_v35, %v2301_v25  ;;  %v1557_v56 = vmul.f32 %v1541_v49, %v2298_v21 }
 0x390   : > { %v1576_v57 = vadd.f32 %v1560_v52, %v2308_v29  ;;  %v1575_v58 = vadd.f32 %v1559_v53, %v2304_v26 }
 0x391   : > { %v1574_v0 = vadd.f32 %v2085_v59, %v1558_v55  ;;  %v1573_v3 = vadd.f32 %v2086_v1, %v1557_v56 }
 0x392   : > { %v1599_v43 = vmul.f32 %v2645_v54, %v1576_v57  ;;  %v1598_v37 = vmul.f32 %v2645_v54, %v1575_v58 }
 0x393   : > { %v1597_v25 = vmul.f32 %v2645_v54, %v1574_v0  ;;  %v1596_v21 = vmul.f32 %v2645_v54, %v1573_v3 }
 0x394   : > { %v1621_v5 = vsel %vm903_vm1, %v1599_v43, 0.0  ;;  %v1618_v9 = vsel %vm903_vm1, %v1598_v37, 0.0 }
 0x395   : > { %1622 = vadd.xlane.f32.xlu1 %v1621_v5  ;;  %1619 = vadd.xlane.f32.xlu0 %v1618_v9  ;;  %v1615_v15 = vsel %vm903_vm1, %v1597_v25, 0.0  ;;  %v1612_v13 = vsel %vm903_vm1, %v1596_v21, 0.0 }
 0x396   : > { %v2074_v29 = vpop.eup %2073 }
 0x397   : > { %v2076_v26 = vpop.eup %2075  ;;  %v1547_v10 = vunpack.c.l.bf16 %v2074_v29  ;;  %v1548_v12 = vunpack.c.h.bf16 %v2074_v29 }
 0x398   : > { %v1545_v4 = vunpack.c.l.bf16 %v2076_v26  ;;  %v1546_v19 = vunpack.c.h.bf16 %v2076_v26 }
 0x399   : > { %1616 = vadd.xlane.f32.xlu0 %v1615_v15  ;;  %1613 = vadd.xlane.f32.xlu1 %v1612_v13  ;;  %v1563_v24 = vmul.f32 %v1547_v10, %v2358_v14  ;;  %v1564_v27 = vmul.f32 %v1548_v12, %v2363_v20 }
 0x39a   : > { %v1965_v38 = vpop.f32.mrb[16].mxu1  ;;  %v1561_v30 = vmul.f32 %v1545_v4, %v2336_v62  ;;  %v1562_v31 = vmul.f32 %v1546_v19, %v2339_v63 }
 0x39b   : > { %v1494_v32 = vpop.f32.mrb[17].mxu1  ;;  %v1579_v42 = vadd.f32 %v1563_v24, %v2344_v2  ;;  %v1580_v44 = vadd.f32 %v1564_v27, %v2348_v7  ;;  %v1503_v48 = vadd.f32 %v1965_v38, %v2630_v23 }
 0x39c   : > { %v1966_v45 = vpop.f32.mrb[18].mxu1  ;;  %v1577_v46 = vadd.f32 %v1561_v30, %v2322_v50  ;;  %v1578_v47 = vadd.f32 %v1562_v31, %v2325_v51  ;;  %v1495_v63 = vadd.f32 %v2630_v23, %v1494_v32 }
 0x39d   : > { %v1506_v14 = vadd.f32 %v1966_v45, %v2630_v23  ;;  %v1497_v20 = vpop.f32.mrb[19].mxu1  ;;  %v1602_v35 = vmul.f32 %v2645_v54, %v1579_v42  ;;  %v1603_v62 = vmul.f32 %v2645_v54, %v1580_v44 }
 0x39e   : > { %v1498_v2 = vadd.f32 %v2630_v23, %v1497_v20  ;;  %v1600_v7 = vmul.f32 %v2645_v54, %v1577_v46  ;;  %v1601_v52 = vmul.f32 %v2645_v54, %v1578_v47 }
 0x39f   : > { %v1530_v49 = vpack.c.bf16 %v1506_v14, %v1503_v48  ;;  %v1630_v50 = vsel %vm903_vm1, %v1602_v35, 0.0  ;;  %v1633_v51 = vsel %vm903_vm1, %v1603_v62, 0.0 }
 0x3a0   : > { %v1529_v53 = vpack.c.bf16 %v1498_v2, %v1495_v63  ;;  %1631 = vadd.xlane.f32.xlu0 %v1630_v50  ;;  %1634 = vadd.xlane.f32.xlu1 %v1633_v51  ;;  %v1624_v55 = vsel %vm903_vm1, %v1600_v7, 0.0  ;;  %v1627_v56 = vsel %vm903_vm1, %v1601_v52, 0.0 }
 0x3a1   : > { %2077 = vtanh.bf16 %v1530_v49 }
 0x3a2   : > { %2079 = vtanh.bf16 %v1529_v53 }
 0x3a4   : > { %1625 = vadd.xlane.f32.xlu0 %v1624_v55  ;;  %1628 = vadd.xlane.f32.xlu1 %v1627_v56 }
 0x3ac   : > { %v2078_v57 = vpop.eup %2077 }
 0x3ad   : > { %v2080_v58 = vpop.eup %2079  ;;  %v1552_v59 = vunpack.c.h.bf16 %v2078_v57  ;;  %v1551_v0 = vunpack.c.l.bf16 %v2078_v57 }
 0x3ae   : > { %v1550_v1 = vunpack.c.h.bf16 %v2080_v58  ;;  %v1549_v3 = vunpack.c.l.bf16 %v2080_v58 }
 0x3af   : > { %v1969_v43 = vpop.f32.mrb[20].mxu1  ;;  %v1568_v37 = vmul.f32 %v1552_v59, %v2414_v36  ;;  %v1567_v5 = vmul.f32 %v1551_v0, %v2408_v28 }
 0x3b0   : > { %v1510_v9 = vpop.f32.mrb[21].mxu1  ;;  %v1566_v25 = vmul.f32 %v1550_v1, %v2391_v8  ;;  %v1565_v21 = vmul.f32 %v1549_v3, %v2388_v6  ;;  %v1519_v12 = vadd.f32 %v1969_v43, %v2630_v23 }
 0x3b1   : > { %v1970_v29 = vpop.f32.mrb[22].mxu1  ;;  %v1584_v26 = vadd.f32 %v1568_v37, %v2400_v17  ;;  %v1583_v10 = vadd.f32 %v1567_v5, %v2396_v11  ;;  %v1511_v28 = vadd.f32 %v2630_v23, %v1510_v9 }
 0x3b2   : > { %v1522_v15 = vadd.f32 %v1970_v29, %v2630_v23  ;;  %v1513_v13 = vpop.f32.mrb[23].mxu1  ;;  %v1582_v4 = vadd.f32 %v1566_v25, %v2382_v61  ;;  %v1581_v36 = vadd.f32 %v1565_v21, %v2379_v60 }
 0x3b3   : > { %v1514_v8 = vadd.f32 %v2630_v23, %v1513_v13  ;;  %v1607_v6 = vmul.f32 %v2645_v54, %v1584_v26  ;;  %v1606_v19 = vmul.f32 %v2645_v54, %v1583_v10 }
 0x3b4   : > { %v1532_v17 = vpack.c.bf16 %v1522_v15, %v1519_v12  ;;  %v1605_v11 = vmul.f32 %v2645_v54, %v1582_v4  ;;  %v1604_v61 = vmul.f32 %v2645_v54, %v1581_v36 }
 0x3b5   : > { %v1531_v24 = vpack.c.bf16 %v1514_v8, %v1511_v28  ;;  %v1645_v27 = vsel %vm903_vm1, %v1607_v6, 0.0  ;;  %v1642_v38 = vsel %vm903_vm1, %v1606_v19, 0.0 }
 0x3b6   : > { %2081 = vtanh.bf16 %v1532_v17  ;;  %1646 = vadd.xlane.f32.xlu1 %v1645_v27  ;;  %1643 = vadd.xlane.f32.xlu0 %v1642_v38  ;;  %v1639_v60 = vsel %vm903_vm1, %v1605_v11, 0.0  ;;  %v1636_v23 = vsel %vm903_vm1, %v1604_v61, 0.0 }
 0x3b7   : > { %2083 = vtanh.bf16 %v1531_v24 }
 0x3ba   : > { %1640 = vadd.xlane.f32.xlu1 %v1639_v60  ;;  %1637 = vadd.xlane.f32.xlu0 %v1636_v23 }
 0x3c1   : > { %v2082_v30 = vpop.eup %2081 }
 0x3c2   : > { %v2084_v31 = vpop.eup %2083  ;;  %v1556_v32 = vunpack.c.h.bf16 %v2082_v30  ;;  %v1555_v42 = vunpack.c.l.bf16 %v2082_v30 }
 0x3c3   : > { %v1554_v44 = vunpack.c.h.bf16 %v2084_v31  ;;  %v1553_v45 = vunpack.c.l.bf16 %v2084_v31 }
 0x3c4   : > { %v1572_v46 = vmul.f32 %v1556_v32, %v2457_v40  ;;  %v1571_v47 = vmul.f32 %v1555_v42, %v2454_v34 }
 0x3c5   : > { %v1570_v48 = vmul.f32 %v1554_v44, %v2441_v16  ;;  %v1569_v14 = vmul.f32 %v1553_v45, %v2438_v33 }
 0x3c6   : > { %v1588_v62 = vadd.f32 %v1572_v46, %v2447_v22  ;;  %v1587_v63 = vadd.f32 %v1571_v47, %v2444_v18  ;;  %v1842_v18 = vld [vmem:[#allocation2] ss:$0 sm:$0xff] }
 0x3c7   : > { %v1586_v20 = vadd.f32 %v1570_v48, %v2433_v39  ;;  %v1585_v35 = vadd.f32 %v1569_v14, %v2430_v41 }
 0x3c8   : > { %v1611_v16 = vmul.f32 %v2645_v54, %v1588_v62  ;;  %v1610_v33 = vmul.f32 %v2645_v54, %v1587_v63 }
 0x3c9   : > { %v1609_v2 = vmul.f32 %v2645_v54, %v1586_v20  ;;  %v1608_v7 = vmul.f32 %v2645_v54, %v1585_v35 }
 0x3ca   : > { %v1657_v41 = vsel %vm903_vm1, %v1611_v16, 0.0  ;;  %v1654_v39 = vsel %vm903_vm1, %v1610_v33, 0.0 }
 0x3cb   : > { %v1651_v40 = vsel %vm903_vm1, %v1609_v2, 0.0  ;;  %v1648_v34 = vsel %vm903_vm1, %v1608_v7, 0.0 }
 0x3cc   : > { %1652 = vadd.xlane.f32.xlu1 %v1651_v40  ;;  %1649 = vadd.xlane.f32.xlu0 %v1648_v34 }
 0x3d0   : > { %1658 = vadd.xlane.f32.xlu1 %v1657_v41  ;;  %1655 = vadd.xlane.f32.xlu0 %v1654_v39 }
 0x422   : > { %v1623_v22 = vpop.xlane.xlu1 %1622  ;;  %v1620_v54 = vpop.xlane.xlu0 %1619 }
 0x423   : > { %v1670_v49 = vadd.f32 %v1842_v18, %v1623_v22  ;;  %v1669_v50 = vadd.f32 %v1842_v18, %v1620_v54 }
 0x425   : > { %1687 = vst.msk [vmem:[%s2721_s28 + $0x18] sm:$0xff] %vm1683_vm2, %v1670_v49  ;;  %1686 = vst.msk [vmem:[%s2721_s28 + $0x10] sm:$0xff] %vm1683_vm2, %v1669_v50 }
 0x426   : > { %v1617_v51 = vpop.xlane.xlu0 %1616  ;;  %v1614_v52 = vpop.xlane.xlu1 %1613 }
 0x427   : > { %v1668_v53 = vadd.f32 %v1842_v18, %v1617_v51  ;;  %v1667_v55 = vadd.f32 %v1842_v18, %v1614_v52 }
 0x429   : > { %1685 = vst.msk [vmem:[%s2721_s28 + $0x8] sm:$0xff] %vm1683_vm2, %v1668_v53  ;;  %1684 = vst.msk [vmem:[%s2721_s28] sm:$0xff] %vm1683_vm2, %v1667_v55 }
 0x42d   : > { %v1632_v56 = vpop.xlane.xlu0 %1631  ;;  %v1635_v57 = vpop.xlane.xlu1 %1634 }
 0x42e   : > { %v1673_v58 = vadd.f32 %v1842_v18, %v1632_v56  ;;  %v1674_v59 = vadd.f32 %v1842_v18, %v1635_v57 }
 0x430   : > { %1690 = vst.msk [vmem:[%s2721_s28 + $0x30] sm:$0xff] %vm1683_vm2, %v1673_v58  ;;  %1691 = vst.msk [vmem:[%s2721_s28 + $0x38] sm:$0xff] %vm1683_vm2, %v1674_v59 }
 0x431   : > { %v1626_v0 = vpop.xlane.xlu0 %1625  ;;  %v1629_v1 = vpop.xlane.xlu1 %1628 }
 0x432   : > { %v1671_v3 = vadd.f32 %v1842_v18, %v1626_v0  ;;  %v1672_v43 = vadd.f32 %v1842_v18, %v1629_v1 }
 0x434   : > { %1688 = vst.msk [vmem:[%s2721_s28 + $0x20] sm:$0xff] %vm1683_vm2, %v1671_v3  ;;  %1689 = vst.msk [vmem:[%s2721_s28 + $0x28] sm:$0xff] %vm1683_vm2, %v1672_v43 }
 0x443   : > { %v1647_v37 = vpop.xlane.xlu1 %1646  ;;  %v1644_v5 = vpop.xlane.xlu0 %1643 }
 0x444   : > { %v1678_v9 = vadd.f32 %v1842_v18, %v1647_v37  ;;  %v1677_v25 = vadd.f32 %v1842_v18, %v1644_v5 }
 0x446   : > { %1695 = vst.msk [vmem:[%s2721_s28 + $0x58] sm:$0xff] %vm1683_vm2, %v1678_v9  ;;  %1694 = vst.msk [vmem:[%s2721_s28 + $0x50] sm:$0xff] %vm1683_vm2, %v1677_v25 }
 0x447   : > { %v1641_v21 = vpop.xlane.xlu1 %1640  ;;  %v1638_v29 = vpop.xlane.xlu0 %1637 }
 0x448   : > { %v1676_v26 = vadd.f32 %v1842_v18, %v1641_v21  ;;  %v1675_v10 = vadd.f32 %v1842_v18, %v1638_v29 }
 0x44a   : > { %1693 = vst.msk [vmem:[%s2721_s28 + $0x48] sm:$0xff] %vm1683_vm2, %v1676_v26  ;;  %1692 = vst.msk [vmem:[%s2721_s28 + $0x40] sm:$0xff] %vm1683_vm2, %v1675_v10 }
 0x459   : > { %v1653_v12 = vpop.xlane.xlu1 %1652  ;;  %v1650_v15 = vpop.xlane.xlu0 %1649 }
 0x45a   : > { %v1680_v13 = vadd.f32 %v1842_v18, %v1653_v12  ;;  %v1679_v4 = vadd.f32 %v1842_v18, %v1650_v15 }
 0x45c   : > { %1697 = vst.msk [vmem:[%s2721_s28 + $0x68] sm:$0xff] %vm1683_vm2, %v1680_v13  ;;  %1696 = vst.msk [vmem:[%s2721_s28 + $0x60] sm:$0xff] %vm1683_vm2, %v1679_v4 }
 0x45d   : > { %v1659_v36 = vpop.xlane.xlu1 %1658  ;;  %v1656_v28 = vpop.xlane.xlu0 %1655 }
 0x45e   : > { %v1682_v8 = vadd.f32 %v1842_v18, %v1659_v36  ;;  %v1681_v6 = vadd.f32 %v1842_v18, %v1656_v28 }
 0x460   : > { %1699 = vst.msk [vmem:[%s2721_s28 + $0x78] sm:$0xff] %vm1683_vm2, %v1682_v8  ;;  %1698 = vst.msk [vmem:[%s2721_s28 + $0x70] sm:$0xff] %vm1683_vm2, %v1681_v6 }
 0x461 PF: > { %s25_s27 = sadd.s32 1, %s2093_s27  }
 0x462   : > { %p22_p4 = scmp.ge.s32.totalorder %s25_s27, 4  }
 0x464   :  { %24 = sbr.rel (!%p22_p4) target bundleno = 3 (0x3), region = 108 }

</bundles_post_ra>
